<compile_context>
chip_gen: v6e
topology: v6e:2x2x1
jax: 0.10.0
libtpu: 0.0.40
codegen_flags: <defaults>
</compile_context>

<pallas_src>
import functools

import jax
import jax.numpy as jnp
from jax.experimental import pallas as pl
from jax.experimental.pallas import tpu as pltpu


# ---------------------------------------------------------------------------
# Fused PLE kernel
# ---------------------------------------------------------------------------

def _softmax_rows(logits):
    m = jnp.max(logits, axis=1, keepdims=True)
    p = jnp.exp(logits - m)
    return p * pl.reciprocal(jnp.sum(p, axis=1, keepdims=True), approx=False)


def _make_ple_kernel(eo, eh, th, ns, nsh):
    """eo/eh: experts_out/hidden, th: towers_hidden, ns/nsh: #specific/#shared experts."""
    n_exp = 2 * ns + nsh            # experts per extraction layer (6)
    g12 = ns + nsh                  # task-gate width (4)
    gsh = 2 * ns + nsh              # shared-gate width (6)
    # packed expert order: [task1_*, task2_*, shared_*]
    ids_t1 = tuple(range(ns)) + tuple(range(2 * ns, n_exp))            # (0,1,4,5)
    ids_t2 = tuple(range(ns, 2 * ns)) + tuple(range(2 * ns, n_exp))    # (2,3,4,5)
    ids_sh = tuple(range(n_exp))                                       # (0..5)

    def mix(e_flat, sel, ids):
        # e_flat: (B, n_exp*eo) packed expert outputs; sel: (B, len(ids)) softmax weights
        acc = e_flat[:, ids[0] * eo:(ids[0] + 1) * eo] * sel[:, 0:1]
        for i, e in enumerate(ids[1:], start=1):
            acc = acc + e_flat[:, e * eo:(e + 1) * eo] * sel[:, i:i + 1]
        return acc

    def kernel(x_ref,
               w1h_ref, b1h_ref, w2h_ref, b2h_ref, wgh_ref, bgh_ref,
               w1o_ref, b1o_ref, w2o_ref, b2o_ref, wgo_ref, bgo_ref,
               wt1_ref, bt1_ref, wt2_ref, bt2_ref,
               out_ref):
        x = x_ref[...]

        # ---------- extraction (hidden) layer: 6 experts as 2 packed matmuls ----------
        hh = jnp.maximum(
            jnp.dot(x, w1h_ref[...], preferred_element_type=jnp.float32) + b1h_ref[...],
            0.0)                                                # ReLU (Dropout = identity)
        e_hid = jnp.dot(hh, w2h_ref[...], preferred_element_type=jnp.float32) + b2h_ref[...]
        # e_hid: (B, 6*eo), expert order t1_0,t1_1,t2_0,t2_1,sh_0,sh_1

        # three gates in one matmul
        glog = jnp.dot(x, wgh_ref[...], preferred_element_type=jnp.float32) + bgh_ref[...]
        sel1 = _softmax_rows(glog[:, 0:g12])
        sel2 = _softmax_rows(glog[:, g12:2 * g12])
        sels = _softmax_rows(glog[:, 2 * g12:2 * g12 + gsh])

        gate1 = mix(e_hid, sel1, ids_t1)          # torch.einsum('abc,ba->bc', cat(t1,sh), sel1)
        gate2 = mix(e_hid, sel2, ids_t2)
        gate_share = mix(e_hid, sels, ids_sh)

        # ---------- output layer: 6 experts as 2 block-diagonal matmuls ----------
        x12 = jnp.concatenate([gate1, gate2], axis=1)           # (B, 2*eo)
        xo = jnp.concatenate([x12, gate_share], axis=1)         # (B, 3*eo)

        ho = jnp.maximum(
            jnp.dot(xo, w1o_ref[...], preferred_element_type=jnp.float32) + b1o_ref[...],
            0.0)
        e_out = jnp.dot(ho, w2o_ref[...], preferred_element_type=jnp.float32) + b2o_ref[...]

        # two output gates in one block-diagonal matmul
        glo = jnp.dot(x12, wgo_ref[...], preferred_element_type=jnp.float32) + bgo_ref[...]
        sel1o = _softmax_rows(glo[:, 0:g12])
        sel2o = _softmax_rows(glo[:, g12:2 * g12])

        og1 = mix(e_out, sel1o, ids_t1)
        og2 = mix(e_out, sel2o, ids_t2)

        # ---------- both towers as one block-diagonal MLP -> (B, 2) ----------
        tin = jnp.concatenate([og1, og2], axis=1)               # (B, 2*eo)
        thid = jnp.maximum(
            jnp.dot(tin, wt1_ref[...], preferred_element_type=jnp.float32) + bt1_ref[...],
            0.0)
        out_ref[...] = (jnp.dot(thid, wt2_ref[...], preferred_element_type=jnp.float32)
                        + bt2_ref[...])
        # TODO(synk): Dropout(0.3/0.4) omitted (eval mode); no PRNG path needed.

    return kernel


def ple_fused_forward(hidden, packed, dims):
    """hidden: (B, Din) float32; packed: dict of packed weights; dims: static config."""
    B = hidden.shape[0]
    kernel = _make_ple_kernel(dims["eo"], dims["eh"], dims["th"], dims["ns"], dims["nsh"])

    args = (hidden,
            packed["w1h"], packed["b1h"], packed["w2h"], packed["b2h"],
            packed["wgh"], packed["bgh"],
            packed["w1o"], packed["b1o"], packed["w2o"], packed["b2o"],
            packed["wgo"], packed["bgo"],
            packed["wt1"], packed["bt1"], packed["wt2"], packed["bt2"])

    def fullspec(a):
        nd = a.ndim
        return pl.BlockSpec(a.shape, lambda i, _n=nd: (0,) * _n)

    return pl.pallas_call(
        kernel,
        out_shape=jax.ShapeDtypeStruct((B, 2), jnp.float32),
        grid=(1,),
        in_specs=[fullspec(a) for a in args],
        out_specs=pl.BlockSpec((B, 2), lambda i: (0, 0)),
        compiler_params=pltpu.CompilerParams(
            # single-step grid: keep on one TensorCore (no megacore split at this size)
            dimension_semantics=("arbitrary",)),
    )(*args)


# ---------------------------------------------------------------------------
# Parameter construction + packing (deterministic, synthetic)
# ---------------------------------------------------------------------------

def _linear_params(key, din, dout, scale=0.1):
    kw, kb = jax.random.split(key)
    w = jax.random.normal(kw, (din, dout), jnp.float32) * scale
    b = jax.random.normal(kb, (dout,), jnp.float32) * scale
    return w, b


def _expert_params(key, din, hid, dout):
    k1, k2 = jax.random.split(key)
    w1, b1 = _linear_params(k1, din, hid)
    w2, b2 = _linear_params(k2, hid, dout)
    return dict(w1=w1, b1=b1, w2=w2, b2=b2)


def _pack_expert_bank(experts, total_in, in_offsets, hid, dout):
    """Pack E two-layer experts into:
       W1: (total_in, E*hid) with each expert's fc1 placed at its input offset,
       W2: (E*hid, E*dout) block-diagonal. Zero blocks keep math exact."""
    e_cnt = len(experts)
    w1 = jnp.zeros((total_in, e_cnt * hid), jnp.float32)
    b1 = jnp.zeros((1, e_cnt * hid), jnp.float32)
    w2 = jnp.zeros((e_cnt * hid, e_cnt * dout), jnp.float32)
    b2 = jnp.zeros((1, e_cnt * dout), jnp.float32)
    for e, (p, off) in enumerate(zip(experts, in_offsets)):
        din_e = p["w1"].shape[0]
        w1 = w1.at[off:off + din_e, e * hid:(e + 1) * hid].set(p["w1"])
        b1 = b1.at[0, e * hid:(e + 1) * hid].set(p["b1"])
        w2 = w2.at[e * hid:(e + 1) * hid, e * dout:(e + 1) * dout].set(p["w2"])
        b2 = b2.at[0, e * dout:(e + 1) * dout].set(p["b2"])
    return w1, b1, w2, b2


def make_ple_original_params(key, user_feature_dict, item_feature_dict,
                             emb_dim, hidden_dim,
                             num_specific_experts=2, num_shared_experts=2):
    keys = iter(jax.random.split(key, 64))
    params = {"emb": {}}

    n_cat = 0
    for feat, (num, _) in {**user_feature_dict, **item_feature_dict}.items():
        if num > 1:
            n_cat += 1
            params["emb"][feat] = (jax.random.normal(next(keys), (num, emb_dim),
                                                     jnp.float32) * 0.1)
    n_cont = (len(user_feature_dict) + len(item_feature_dict)) - n_cat
    din = emb_dim * n_cat + n_cont

    ns, nsh = num_specific_experts, num_shared_experts
    eo = eh = th = hidden_dim
    n_exp = 2 * ns + nsh

    # ---- hidden (extraction) layer ----
    hid_t1 = [_expert_params(next(keys), din, eh, eo) for _ in range(ns)]
    hid_t2 = [_expert_params(next(keys), din, eh, eo) for _ in range(ns)]
    hid_sh = [_expert_params(next(keys), din, eh, eo) for _ in range(nsh)]
    g1w, g1b = _linear_params(next(keys), din, ns + nsh)
    g2w, g2b = _linear_params(next(keys), din, ns + nsh)
    gsw, gsb = _linear_params(next(keys), din, 2 * ns + nsh)

    w1h, b1h, w2h, b2h = _pack_expert_bank(
        hid_t1 + hid_t2 + hid_sh, din, [0] * n_exp, eh, eo)
    wgh = jnp.concatenate([g1w, g2w, gsw], axis=1)            # (din, 14)
    bgh = jnp.concatenate([g1b, g2b, gsb])[None, :]           # (1, 14)

    # ---- output layer ----
    out_t1 = [_expert_params(next(keys), eo, eh, eo) for _ in range(ns)]
    out_t2 = [_expert_params(next(keys), eo, eh, eo) for _ in range(ns)]
    out_sh = [_expert_params(next(keys), eo, eh, eo) for _ in range(nsh)]
    og1w, og1b = _linear_params(next(keys), eo, ns + nsh)
    og2w, og2b = _linear_params(next(keys), eo, ns + nsh)
    tower1 = _expert_params(next(keys), eo, th, 1)
    tower2 = _expert_params(next(keys), eo, th, 1)

    # task1 experts read gate1 (offset 0), task2 read gate2 (offset eo),
    # shared read gate_share (offset 2*eo) from the concatenated (B, 3*eo) input.
    offsets = [0] * ns + [eo] * ns + [2 * eo] * nsh
    w1o, b1o, w2o, b2o = _pack_expert_bank(
        out_t1 + out_t2 + out_sh, 3 * eo, offsets, eh, eo)

    wgo = jnp.zeros((2 * eo, 2 * (ns + nsh)), jnp.float32)
    wgo = wgo.at[0:eo, 0:ns + nsh].set(og1w)
    wgo = wgo.at[eo:2 * eo, ns + nsh:2 * (ns + nsh)].set(og2w)
    bgo = jnp.concatenate([og1b, og2b])[None, :]              # (1, 8)

    wt1, bt1, wt2, bt2 = _pack_expert_bank([tower1, tower2], 2 * eo, [0, eo], th, 1)

    params["packed"] = dict(
        w1h=w1h, b1h=b1h, w2h=w2h, b2h=b2h, wgh=wgh, bgh=bgh,
        w1o=w1o, b1o=b1o, w2o=w2o, b2o=b2o, wgo=wgo, bgo=bgo,
        wt1=wt1, bt1=bt1, wt2=wt2, bt2=bt2)

    dims = dict(eo=eo, eh=eh, th=th, ns=ns, nsh=nsh, din=din)
    return params, dims


# ---------------------------------------------------------------------------
# Forward pass (embedding lookup / concat = plain-JAX glue, rest = fused kernel)
# ---------------------------------------------------------------------------

def ple_original_forward(params, x, user_feature_dict, item_feature_dict, dims):
    """x: (B, n_features) float32; categorical columns hold integer ids as floats."""
    embed_list = []
    # PyTorch forward iterates user features, then item features, in dict order.
    for feat_dict in (user_feature_dict, item_feature_dict):
        for feat, (num, idx) in feat_dict.items():
            if num > 1:
                ids = x[:, idx].astype(jnp.int32)
                embed_list.append(jnp.take(params["emb"][feat], ids, axis=0))
            else:
                embed_list.append(x[:, idx][:, None])
    hidden = jnp.concatenate(embed_list, axis=1).astype(jnp.float32)

    out = ple_fused_forward(hidden, params["packed"], dims)   # (B, 2)
    return out[:, 0:1], out[:, 1:2]


# ---------------------------------------------------------------------------
# Main
# ---------------------------------------------------------------------------

if __name__ == "__main__":
    # feature_dict: name -> (cardinality, column_index); cardinality 1 == continuous
    user_feature_dict = {"user_id": (5, 0), "user_age": (1, 1)}
    item_feature_dict = {"item_id": (6, 2), "item_price": (1, 3)}
    emb_dim = 16
    hidden_dim = 32
    batch = 8

    key = jax.random.PRNGKey(0)
    k_params, k_u, k_i, k_c1, k_c2 = jax.random.split(key, 5)

    params, dims = make_ple_original_params(
        k_params, user_feature_dict, item_feature_dict, emb_dim, hidden_dim)

    # deterministic input x: (B, 4); cols 0,2 categorical ids, cols 1,3 continuous
    user_ids = jax.random.randint(k_u, (batch,), 0, 5).astype(jnp.float32)
    item_ids = jax.random.randint(k_i, (batch,), 0, 6).astype(jnp.float32)
    user_age = jax.random.normal(k_c1, (batch,), jnp.float32)
    item_price = jax.random.normal(k_c2, (batch,), jnp.float32)
    x = jnp.stack([user_ids, user_age, item_ids, item_price], axis=1)

    fwd = jax.jit(functools.partial(ple_original_forward,
                                    user_feature_dict=user_feature_dict,
                                    item_feature_dict=item_feature_dict,
                                    dims=dims))
    out1, out2 = fwd(params, x)
    jax.block_until_ready((out1, out2))

    assert out1.shape == (batch, 1) and out2.shape == (batch, 1)
    assert bool(jnp.all(jnp.isfinite(out1))) and bool(jnp.all(jnp.isfinite(out2)))
    print("KERNEL_OK")
</pallas_src>

<mosaic_0001>
module attributes {stable_mosaic.version = 11 : i64} {
  func.func @kernel(%arg0: i32, %arg1: memref<8x34xf32, #tpu.memory_space<vmem>>, %arg2: memref<34x192xf32, #tpu.memory_space<vmem>>, %arg3: memref<1x192xf32, #tpu.memory_space<vmem>>, %arg4: memref<192x192xf32, #tpu.memory_space<vmem>>, %arg5: memref<1x192xf32, #tpu.memory_space<vmem>>, %arg6: memref<34x14xf32, #tpu.memory_space<vmem>>, %arg7: memref<1x14xf32, #tpu.memory_space<vmem>>, %arg8: memref<96x192xf32, #tpu.memory_space<vmem>>, %arg9: memref<1x192xf32, #tpu.memory_space<vmem>>, %arg10: memref<192x192xf32, #tpu.memory_space<vmem>>, %arg11: memref<1x192xf32, #tpu.memory_space<vmem>>, %arg12: memref<64x8xf32, #tpu.memory_space<vmem>>, %arg13: memref<1x8xf32, #tpu.memory_space<vmem>>, %arg14: memref<64x64xf32, #tpu.memory_space<vmem>>, %arg15: memref<1x64xf32, #tpu.memory_space<vmem>>, %arg16: memref<64x2xf32, #tpu.memory_space<vmem>>, %arg17: memref<1x2xf32, #tpu.memory_space<vmem>>, %arg18: memref<8x2xf32, #tpu.memory_space<vmem>>) attributes {dimension_semantics = [#tpu.dimension_semantics<arbitrary>], iteration_bounds = array<i64: 1>, scalar_prefetch = 0 : i64, scratch_operands = 0 : i64, tpu.core_type = #tpu.core_type<tc>, window_params = [{pipeline_mode = #tpu.pipeline_mode<synchronous>, transform_indices = @transform_0, window_bounds = array<i64: 8, 34>}, {pipeline_mode = #tpu.pipeline_mode<synchronous>, transform_indices = @transform_1, window_bounds = array<i64: 34, 192>}, {pipeline_mode = #tpu.pipeline_mode<synchronous>, transform_indices = @transform_2, window_bounds = array<i64: 1, 192>}, {pipeline_mode = #tpu.pipeline_mode<synchronous>, transform_indices = @transform_3, window_bounds = array<i64: 192, 192>}, {pipeline_mode = #tpu.pipeline_mode<synchronous>, transform_indices = @transform_4, window_bounds = array<i64: 1, 192>}, {pipeline_mode = #tpu.pipeline_mode<synchronous>, transform_indices = @transform_5, window_bounds = array<i64: 34, 14>}, {pipeline_mode = #tpu.pipeline_mode<synchronous>, transform_indices = @transform_6, window_bounds = array<i64: 1, 14>}, {pipeline_mode = #tpu.pipeline_mode<synchronous>, transform_indices = @transform_7, window_bounds = array<i64: 96, 192>}, {pipeline_mode = #tpu.pipeline_mode<synchronous>, transform_indices = @transform_8, window_bounds = array<i64: 1, 192>}, {pipeline_mode = #tpu.pipeline_mode<synchronous>, transform_indices = @transform_9, window_bounds = array<i64: 192, 192>}, {pipeline_mode = #tpu.pipeline_mode<synchronous>, transform_indices = @transform_10, window_bounds = array<i64: 1, 192>}, {pipeline_mode = #tpu.pipeline_mode<synchronous>, transform_indices = @transform_11, window_bounds = array<i64: 64, 8>}, {pipeline_mode = #tpu.pipeline_mode<synchronous>, transform_indices = @transform_12, window_bounds = array<i64: 1, 8>}, {pipeline_mode = #tpu.pipeline_mode<synchronous>, transform_indices = @transform_13, window_bounds = array<i64: 64, 64>}, {pipeline_mode = #tpu.pipeline_mode<synchronous>, transform_indices = @transform_14, window_bounds = array<i64: 1, 64>}, {pipeline_mode = #tpu.pipeline_mode<synchronous>, transform_indices = @transform_15, window_bounds = array<i64: 64, 2>}, {pipeline_mode = #tpu.pipeline_mode<synchronous>, transform_indices = @transform_16, window_bounds = array<i64: 1, 2>}, {pipeline_mode = #tpu.pipeline_mode<synchronous>, transform_indices = @transform_17, window_bounds = array<i64: 8, 2>}]} {
    %c0 = arith.constant 0 : index
    %c0_0 = arith.constant 0 : index
    %0 = vector.load %arg1[%c0, %c0_0] : memref<8x34xf32, #tpu.memory_space<vmem>>, vector<8x34xf32>
    %c0_1 = arith.constant 0 : index
    %c0_2 = arith.constant 0 : index
    %1 = vector.load %arg2[%c0_1, %c0_2] : memref<34x192xf32, #tpu.memory_space<vmem>>, vector<34x192xf32>
    %cst = arith.constant dense<0.000000e+00> : vector<8x192xf32>
    %2 = tpu.matmul %0, %1, %cst {dimension_numbers = #tpu.dot_dimension_numbers<[1], [0], [0], [1], [0, 0, 1, 1], [], []>} : vector<8x34xf32>, vector<34x192xf32>, vector<8x192xf32> -> vector<8x192xf32>
    %c0_3 = arith.constant 0 : index
    %c0_4 = arith.constant 0 : index
    %3 = vector.load %arg3[%c0_3, %c0_4] : memref<1x192xf32, #tpu.memory_space<vmem>>, vector<1x192xf32>
    %4 = vector.broadcast %3 : vector<1x192xf32> to vector<8x192xf32>
    %5 = arith.addf %2, %4 : vector<8x192xf32>
    %cst_5 = arith.constant 0.000000e+00 : f32
    %6 = vector.broadcast %cst_5 : f32 to vector<8x192xf32>
    %7 = arith.maximumf %5, %6 : vector<8x192xf32>
    %c0_6 = arith.constant 0 : index
    %c0_7 = arith.constant 0 : index
    %8 = vector.load %arg4[%c0_6, %c0_7] : memref<192x192xf32, #tpu.memory_space<vmem>>, vector<192x192xf32>
    %cst_8 = arith.constant dense<0.000000e+00> : vector<8x192xf32>
    %9 = tpu.matmul %7, %8, %cst_8 {dimension_numbers = #tpu.dot_dimension_numbers<[1], [0], [0], [1], [0, 0, 1, 1], [], []>} : vector<8x192xf32>, vector<192x192xf32>, vector<8x192xf32> -> vector<8x192xf32>
    %c0_9 = arith.constant 0 : index
    %c0_10 = arith.constant 0 : index
    %10 = vector.load %arg5[%c0_9, %c0_10] : memref<1x192xf32, #tpu.memory_space<vmem>>, vector<1x192xf32>
    %11 = vector.broadcast %10 : vector<1x192xf32> to vector<8x192xf32>
    %12 = arith.addf %9, %11 : vector<8x192xf32>
    %c0_11 = arith.constant 0 : index
    %c0_12 = arith.constant 0 : index
    %13 = vector.load %arg6[%c0_11, %c0_12] : memref<34x14xf32, #tpu.memory_space<vmem>>, vector<34x14xf32>
    %cst_13 = arith.constant dense<0.000000e+00> : vector<8x14xf32>
    %14 = tpu.matmul %0, %13, %cst_13 {dimension_numbers = #tpu.dot_dimension_numbers<[1], [0], [0], [1], [0, 0, 1, 1], [], []>} : vector<8x34xf32>, vector<34x14xf32>, vector<8x14xf32> -> vector<8x14xf32>
    %c0_14 = arith.constant 0 : index
    %c0_15 = arith.constant 0 : index
    %15 = vector.load %arg7[%c0_14, %c0_15] : memref<1x14xf32, #tpu.memory_space<vmem>>, vector<1x14xf32>
    %16 = vector.broadcast %15 : vector<1x14xf32> to vector<8x14xf32>
    %17 = arith.addf %14, %16 : vector<8x14xf32>
    %18 = vector.extract_strided_slice %17 {offsets = [0, 0], sizes = [8, 4], strides = [1, 1]} : vector<8x14xf32> to vector<8x4xf32>
    %cst_16 = arith.constant dense<0xFF800000> : vector<8xf32>
    %19 = vector.multi_reduction <maximumf>, %18, %cst_16 [1] : vector<8x4xf32> to vector<8xf32>
    %20 = vector.shape_cast %19 : vector<8xf32> to vector<8x1xf32>
    %21 = vector.broadcast %20 : vector<8x1xf32> to vector<8x4xf32>
    %22 = arith.subf %18, %21 : vector<8x4xf32>
    %23 = math.exp %22 : vector<8x4xf32>
    %cst_17 = arith.constant dense<0.000000e+00> : vector<8xf32>
    %24 = vector.multi_reduction <add>, %23, %cst_17 [1] : vector<8x4xf32> to vector<8xf32>
    %25 = vector.shape_cast %24 : vector<8xf32> to vector<8x1xf32>
    %26 = tpu.reciprocal %25 : vector<8x1xf32> -> vector<8x1xf32>
    %27 = vector.broadcast %26 : vector<8x1xf32> to vector<8x4xf32>
    %28 = arith.mulf %23, %27 : vector<8x4xf32>
    %29 = vector.extract_strided_slice %17 {offsets = [0, 4], sizes = [8, 4], strides = [1, 1]} : vector<8x14xf32> to vector<8x4xf32>
    %cst_18 = arith.constant dense<0xFF800000> : vector<8xf32>
    %30 = vector.multi_reduction <maximumf>, %29, %cst_18 [1] : vector<8x4xf32> to vector<8xf32>
    %31 = vector.shape_cast %30 : vector<8xf32> to vector<8x1xf32>
    %32 = vector.broadcast %31 : vector<8x1xf32> to vector<8x4xf32>
    %33 = arith.subf %29, %32 : vector<8x4xf32>
    %34 = math.exp %33 : vector<8x4xf32>
    %cst_19 = arith.constant dense<0.000000e+00> : vector<8xf32>
    %35 = vector.multi_reduction <add>, %34, %cst_19 [1] : vector<8x4xf32> to vector<8xf32>
    %36 = vector.shape_cast %35 : vector<8xf32> to vector<8x1xf32>
    %37 = tpu.reciprocal %36 : vector<8x1xf32> -> vector<8x1xf32>
    %38 = vector.broadcast %37 : vector<8x1xf32> to vector<8x4xf32>
    %39 = arith.mulf %34, %38 : vector<8x4xf32>
    %40 = vector.extract_strided_slice %17 {offsets = [0, 8], sizes = [8, 6], strides = [1, 1]} : vector<8x14xf32> to vector<8x6xf32>
    %cst_20 = arith.constant dense<0xFF800000> : vector<8xf32>
    %41 = vector.multi_reduction <maximumf>, %40, %cst_20 [1] : vector<8x6xf32> to vector<8xf32>
    %42 = vector.shape_cast %41 : vector<8xf32> to vector<8x1xf32>
    %43 = vector.broadcast %42 : vector<8x1xf32> to vector<8x6xf32>
    %44 = arith.subf %40, %43 : vector<8x6xf32>
    %45 = math.exp %44 : vector<8x6xf32>
    %cst_21 = arith.constant dense<0.000000e+00> : vector<8xf32>
    %46 = vector.multi_reduction <add>, %45, %cst_21 [1] : vector<8x6xf32> to vector<8xf32>
    %47 = vector.shape_cast %46 : vector<8xf32> to vector<8x1xf32>
    %48 = tpu.reciprocal %47 : vector<8x1xf32> -> vector<8x1xf32>
    %49 = vector.broadcast %48 : vector<8x1xf32> to vector<8x6xf32>
    %50 = arith.mulf %45, %49 : vector<8x6xf32>
    %51 = vector.extract_strided_slice %12 {offsets = [0, 0], sizes = [8, 32], strides = [1, 1]} : vector<8x192xf32> to vector<8x32xf32>
    %52 = vector.extract_strided_slice %28 {offsets = [0, 0], sizes = [8, 1], strides = [1, 1]} : vector<8x4xf32> to vector<8x1xf32>
    %53 = vector.broadcast %52 : vector<8x1xf32> to vector<8x32xf32>
    %54 = arith.mulf %51, %53 : vector<8x32xf32>
    %55 = vector.extract_strided_slice %12 {offsets = [0, 32], sizes = [8, 32], strides = [1, 1]} : vector<8x192xf32> to vector<8x32xf32>
    %56 = vector.extract_strided_slice %28 {offsets = [0, 1], sizes = [8, 1], strides = [1, 1]} : vector<8x4xf32> to vector<8x1xf32>
    %57 = vector.broadcast %56 : vector<8x1xf32> to vector<8x32xf32>
    %58 = arith.mulf %55, %57 : vector<8x32xf32>
    %59 = arith.addf %54, %58 : vector<8x32xf32>
    %60 = vector.extract_strided_slice %12 {offsets = [0, 128], sizes = [8, 32], strides = [1, 1]} : vector<8x192xf32> to vector<8x32xf32>
    %61 = vector.extract_strided_slice %28 {offsets = [0, 2], sizes = [8, 1], strides = [1, 1]} : vector<8x4xf32> to vector<8x1xf32>
    %62 = vector.broadcast %61 : vector<8x1xf32> to vector<8x32xf32>
    %63 = arith.mulf %60, %62 : vector<8x32xf32>
    %64 = arith.addf %59, %63 : vector<8x32xf32>
    %65 = vector.extract_strided_slice %12 {offsets = [0, 160], sizes = [8, 32], strides = [1, 1]} : vector<8x192xf32> to vector<8x32xf32>
    %66 = vector.extract_strided_slice %28 {offsets = [0, 3], sizes = [8, 1], strides = [1, 1]} : vector<8x4xf32> to vector<8x1xf32>
    %67 = vector.broadcast %66 : vector<8x1xf32> to vector<8x32xf32>
    %68 = arith.mulf %65, %67 : vector<8x32xf32>
    %69 = arith.addf %64, %68 : vector<8x32xf32>
    %70 = vector.extract_strided_slice %12 {offsets = [0, 64], sizes = [8, 32], strides = [1, 1]} : vector<8x192xf32> to vector<8x32xf32>
    %71 = vector.extract_strided_slice %39 {offsets = [0, 0], sizes = [8, 1], strides = [1, 1]} : vector<8x4xf32> to vector<8x1xf32>
    %72 = vector.broadcast %71 : vector<8x1xf32> to vector<8x32xf32>
    %73 = arith.mulf %70, %72 : vector<8x32xf32>
    %74 = vector.extract_strided_slice %12 {offsets = [0, 96], sizes = [8, 32], strides = [1, 1]} : vector<8x192xf32> to vector<8x32xf32>
    %75 = vector.extract_strided_slice %39 {offsets = [0, 1], sizes = [8, 1], strides = [1, 1]} : vector<8x4xf32> to vector<8x1xf32>
    %76 = vector.broadcast %75 : vector<8x1xf32> to vector<8x32xf32>
    %77 = arith.mulf %74, %76 : vector<8x32xf32>
    %78 = arith.addf %73, %77 : vector<8x32xf32>
    %79 = vector.extract_strided_slice %12 {offsets = [0, 128], sizes = [8, 32], strides = [1, 1]} : vector<8x192xf32> to vector<8x32xf32>
    %80 = vector.extract_strided_slice %39 {offsets = [0, 2], sizes = [8, 1], strides = [1, 1]} : vector<8x4xf32> to vector<8x1xf32>
    %81 = vector.broadcast %80 : vector<8x1xf32> to vector<8x32xf32>
    %82 = arith.mulf %79, %81 : vector<8x32xf32>
    %83 = arith.addf %78, %82 : vector<8x32xf32>
    %84 = vector.extract_strided_slice %12 {offsets = [0, 160], sizes = [8, 32], strides = [1, 1]} : vector<8x192xf32> to vector<8x32xf32>
    %85 = vector.extract_strided_slice %39 {offsets = [0, 3], sizes = [8, 1], strides = [1, 1]} : vector<8x4xf32> to vector<8x1xf32>
    %86 = vector.broadcast %85 : vector<8x1xf32> to vector<8x32xf32>
    %87 = arith.mulf %84, %86 : vector<8x32xf32>
    %88 = arith.addf %83, %87 : vector<8x32xf32>
    %89 = vector.extract_strided_slice %12 {offsets = [0, 0], sizes = [8, 32], strides = [1, 1]} : vector<8x192xf32> to vector<8x32xf32>
    %90 = vector.extract_strided_slice %50 {offsets = [0, 0], sizes = [8, 1], strides = [1, 1]} : vector<8x6xf32> to vector<8x1xf32>
    %91 = vector.broadcast %90 : vector<8x1xf32> to vector<8x32xf32>
    %92 = arith.mulf %89, %91 : vector<8x32xf32>
    %93 = vector.extract_strided_slice %12 {offsets = [0, 32], sizes = [8, 32], strides = [1, 1]} : vector<8x192xf32> to vector<8x32xf32>
    %94 = vector.extract_strided_slice %50 {offsets = [0, 1], sizes = [8, 1], strides = [1, 1]} : vector<8x6xf32> to vector<8x1xf32>
    %95 = vector.broadcast %94 : vector<8x1xf32> to vector<8x32xf32>
    %96 = arith.mulf %93, %95 : vector<8x32xf32>
    %97 = arith.addf %92, %96 : vector<8x32xf32>
    %98 = vector.extract_strided_slice %12 {offsets = [0, 64], sizes = [8, 32], strides = [1, 1]} : vector<8x192xf32> to vector<8x32xf32>
    %99 = vector.extract_strided_slice %50 {offsets = [0, 2], sizes = [8, 1], strides = [1, 1]} : vector<8x6xf32> to vector<8x1xf32>
    %100 = vector.broadcast %99 : vector<8x1xf32> to vector<8x32xf32>
    %101 = arith.mulf %98, %100 : vector<8x32xf32>
    %102 = arith.addf %97, %101 : vector<8x32xf32>
    %103 = vector.extract_strided_slice %12 {offsets = [0, 96], sizes = [8, 32], strides = [1, 1]} : vector<8x192xf32> to vector<8x32xf32>
    %104 = vector.extract_strided_slice %50 {offsets = [0, 3], sizes = [8, 1], strides = [1, 1]} : vector<8x6xf32> to vector<8x1xf32>
    %105 = vector.broadcast %104 : vector<8x1xf32> to vector<8x32xf32>
    %106 = arith.mulf %103, %105 : vector<8x32xf32>
    %107 = arith.addf %102, %106 : vector<8x32xf32>
    %108 = vector.extract_strided_slice %12 {offsets = [0, 128], sizes = [8, 32], strides = [1, 1]} : vector<8x192xf32> to vector<8x32xf32>
    %109 = vector.extract_strided_slice %50 {offsets = [0, 4], sizes = [8, 1], strides = [1, 1]} : vector<8x6xf32> to vector<8x1xf32>
    %110 = vector.broadcast %109 : vector<8x1xf32> to vector<8x32xf32>
    %111 = arith.mulf %108, %110 : vector<8x32xf32>
    %112 = arith.addf %107, %111 : vector<8x32xf32>
    %113 = vector.extract_strided_slice %12 {offsets = [0, 160], sizes = [8, 32], strides = [1, 1]} : vector<8x192xf32> to vector<8x32xf32>
    %114 = vector.extract_strided_slice %50 {offsets = [0, 5], sizes = [8, 1], strides = [1, 1]} : vector<8x6xf32> to vector<8x1xf32>
    %115 = vector.broadcast %114 : vector<8x1xf32> to vector<8x32xf32>
    %116 = arith.mulf %113, %115 : vector<8x32xf32>
    %117 = arith.addf %112, %116 : vector<8x32xf32>
    %118 = tpu.concatenate %69, %88 in 1 : vector<8x32xf32>, vector<8x32xf32> -> vector<8x64xf32>
    %119 = tpu.concatenate %118, %117 in 1 : vector<8x64xf32>, vector<8x32xf32> -> vector<8x96xf32>
    %c0_22 = arith.constant 0 : index
    %c0_23 = arith.constant 0 : index
    %120 = vector.load %arg8[%c0_22, %c0_23] : memref<96x192xf32, #tpu.memory_space<vmem>>, vector<96x192xf32>
    %cst_24 = arith.constant dense<0.000000e+00> : vector<8x192xf32>
    %121 = tpu.matmul %119, %120, %cst_24 {dimension_numbers = #tpu.dot_dimension_numbers<[1], [0], [0], [1], [0, 0, 1, 1], [], []>} : vector<8x96xf32>, vector<96x192xf32>, vector<8x192xf32> -> vector<8x192xf32>
    %c0_25 = arith.constant 0 : index
    %c0_26 = arith.constant 0 : index
    %122 = vector.load %arg9[%c0_25, %c0_26] : memref<1x192xf32, #tpu.memory_space<vmem>>, vector<1x192xf32>
    %123 = vector.broadcast %122 : vector<1x192xf32> to vector<8x192xf32>
    %124 = arith.addf %121, %123 : vector<8x192xf32>
    %cst_27 = arith.constant 0.000000e+00 : f32
    %125 = vector.broadcast %cst_27 : f32 to vector<8x192xf32>
    %126 = arith.maximumf %124, %125 : vector<8x192xf32>
    %c0_28 = arith.constant 0 : index
    %c0_29 = arith.constant 0 : index
    %127 = vector.load %arg10[%c0_28, %c0_29] : memref<192x192xf32, #tpu.memory_space<vmem>>, vector<192x192xf32>
    %cst_30 = arith.constant dense<0.000000e+00> : vector<8x192xf32>
    %128 = tpu.matmul %126, %127, %cst_30 {dimension_numbers = #tpu.dot_dimension_numbers<[1], [0], [0], [1], [0, 0, 1, 1], [], []>} : vector<8x192xf32>, vector<192x192xf32>, vector<8x192xf32> -> vector<8x192xf32>
    %c0_31 = arith.constant 0 : index
    %c0_32 = arith.constant 0 : index
    %129 = vector.load %arg11[%c0_31, %c0_32] : memref<1x192xf32, #tpu.memory_space<vmem>>, vector<1x192xf32>
    %130 = vector.broadcast %129 : vector<1x192xf32> to vector<8x192xf32>
    %131 = arith.addf %128, %130 : vector<8x192xf32>
    %c0_33 = arith.constant 0 : index
    %c0_34 = arith.constant 0 : index
    %132 = vector.load %arg12[%c0_33, %c0_34] : memref<64x8xf32, #tpu.memory_space<vmem>>, vector<64x8xf32>
    %cst_35 = arith.constant dense<0.000000e+00> : vector<8x8xf32>
    %133 = tpu.matmul %118, %132, %cst_35 {dimension_numbers = #tpu.dot_dimension_numbers<[1], [0], [0], [1], [0, 0, 1, 1], [], []>} : vector<8x64xf32>, vector<64x8xf32>, vector<8x8xf32> -> vector<8x8xf32>
    %c0_36 = arith.constant 0 : index
    %c0_37 = arith.constant 0 : index
    %134 = vector.load %arg13[%c0_36, %c0_37] : memref<1x8xf32, #tpu.memory_space<vmem>>, vector<1x8xf32>
    %135 = vector.broadcast %134 : vector<1x8xf32> to vector<8x8xf32>
    %136 = arith.addf %133, %135 : vector<8x8xf32>
    %137 = vector.extract_strided_slice %136 {offsets = [0, 0], sizes = [8, 4], strides = [1, 1]} : vector<8x8xf32> to vector<8x4xf32>
    %cst_38 = arith.constant dense<0xFF800000> : vector<8xf32>
    %138 = vector.multi_reduction <maximumf>, %137, %cst_38 [1] : vector<8x4xf32> to vector<8xf32>
    %139 = vector.shape_cast %138 : vector<8xf32> to vector<8x1xf32>
    %140 = vector.broadcast %139 : vector<8x1xf32> to vector<8x4xf32>
    %141 = arith.subf %137, %140 : vector<8x4xf32>
    %142 = math.exp %141 : vector<8x4xf32>
    %cst_39 = arith.constant dense<0.000000e+00> : vector<8xf32>
    %143 = vector.multi_reduction <add>, %142, %cst_39 [1] : vector<8x4xf32> to vector<8xf32>
    %144 = vector.shape_cast %143 : vector<8xf32> to vector<8x1xf32>
    %145 = tpu.reciprocal %144 : vector<8x1xf32> -> vector<8x1xf32>
    %146 = vector.broadcast %145 : vector<8x1xf32> to vector<8x4xf32>
    %147 = arith.mulf %142, %146 : vector<8x4xf32>
    %148 = vector.extract_strided_slice %136 {offsets = [0, 4], sizes = [8, 4], strides = [1, 1]} : vector<8x8xf32> to vector<8x4xf32>
    %cst_40 = arith.constant dense<0xFF800000> : vector<8xf32>
    %149 = vector.multi_reduction <maximumf>, %148, %cst_40 [1] : vector<8x4xf32> to vector<8xf32>
    %150 = vector.shape_cast %149 : vector<8xf32> to vector<8x1xf32>
    %151 = vector.broadcast %150 : vector<8x1xf32> to vector<8x4xf32>
    %152 = arith.subf %148, %151 : vector<8x4xf32>
    %153 = math.exp %152 : vector<8x4xf32>
    %cst_41 = arith.constant dense<0.000000e+00> : vector<8xf32>
    %154 = vector.multi_reduction <add>, %153, %cst_41 [1] : vector<8x4xf32> to vector<8xf32>
    %155 = vector.shape_cast %154 : vector<8xf32> to vector<8x1xf32>
    %156 = tpu.reciprocal %155 : vector<8x1xf32> -> vector<8x1xf32>
    %157 = vector.broadcast %156 : vector<8x1xf32> to vector<8x4xf32>
    %158 = arith.mulf %153, %157 : vector<8x4xf32>
    %159 = vector.extract_strided_slice %131 {offsets = [0, 0], sizes = [8, 32], strides = [1, 1]} : vector<8x192xf32> to vector<8x32xf32>
    %160 = vector.extract_strided_slice %147 {offsets = [0, 0], sizes = [8, 1], strides = [1, 1]} : vector<8x4xf32> to vector<8x1xf32>
    %161 = vector.broadcast %160 : vector<8x1xf32> to vector<8x32xf32>
    %162 = arith.mulf %159, %161 : vector<8x32xf32>
    %163 = vector.extract_strided_slice %131 {offsets = [0, 32], sizes = [8, 32], strides = [1, 1]} : vector<8x192xf32> to vector<8x32xf32>
    %164 = vector.extract_strided_slice %147 {offsets = [0, 1], sizes = [8, 1], strides = [1, 1]} : vector<8x4xf32> to vector<8x1xf32>
    %165 = vector.broadcast %164 : vector<8x1xf32> to vector<8x32xf32>
    %166 = arith.mulf %163, %165 : vector<8x32xf32>
    %167 = arith.addf %162, %166 : vector<8x32xf32>
    %168 = vector.extract_strided_slice %131 {offsets = [0, 128], sizes = [8, 32], strides = [1, 1]} : vector<8x192xf32> to vector<8x32xf32>
    %169 = vector.extract_strided_slice %147 {offsets = [0, 2], sizes = [8, 1], strides = [1, 1]} : vector<8x4xf32> to vector<8x1xf32>
    %170 = vector.broadcast %169 : vector<8x1xf32> to vector<8x32xf32>
    %171 = arith.mulf %168, %170 : vector<8x32xf32>
    %172 = arith.addf %167, %171 : vector<8x32xf32>
    %173 = vector.extract_strided_slice %131 {offsets = [0, 160], sizes = [8, 32], strides = [1, 1]} : vector<8x192xf32> to vector<8x32xf32>
    %174 = vector.extract_strided_slice %147 {offsets = [0, 3], sizes = [8, 1], strides = [1, 1]} : vector<8x4xf32> to vector<8x1xf32>
    %175 = vector.broadcast %174 : vector<8x1xf32> to vector<8x32xf32>
    %176 = arith.mulf %173, %175 : vector<8x32xf32>
    %177 = arith.addf %172, %176 : vector<8x32xf32>
    %178 = vector.extract_strided_slice %131 {offsets = [0, 64], sizes = [8, 32], strides = [1, 1]} : vector<8x192xf32> to vector<8x32xf32>
    %179 = vector.extract_strided_slice %158 {offsets = [0, 0], sizes = [8, 1], strides = [1, 1]} : vector<8x4xf32> to vector<8x1xf32>
    %180 = vector.broadcast %179 : vector<8x1xf32> to vector<8x32xf32>
    %181 = arith.mulf %178, %180 : vector<8x32xf32>
    %182 = vector.extract_strided_slice %131 {offsets = [0, 96], sizes = [8, 32], strides = [1, 1]} : vector<8x192xf32> to vector<8x32xf32>
    %183 = vector.extract_strided_slice %158 {offsets = [0, 1], sizes = [8, 1], strides = [1, 1]} : vector<8x4xf32> to vector<8x1xf32>
    %184 = vector.broadcast %183 : vector<8x1xf32> to vector<8x32xf32>
    %185 = arith.mulf %182, %184 : vector<8x32xf32>
    %186 = arith.addf %181, %185 : vector<8x32xf32>
    %187 = vector.extract_strided_slice %131 {offsets = [0, 128], sizes = [8, 32], strides = [1, 1]} : vector<8x192xf32> to vector<8x32xf32>
    %188 = vector.extract_strided_slice %158 {offsets = [0, 2], sizes = [8, 1], strides = [1, 1]} : vector<8x4xf32> to vector<8x1xf32>
    %189 = vector.broadcast %188 : vector<8x1xf32> to vector<8x32xf32>
    %190 = arith.mulf %187, %189 : vector<8x32xf32>
    %191 = arith.addf %186, %190 : vector<8x32xf32>
    %192 = vector.extract_strided_slice %131 {offsets = [0, 160], sizes = [8, 32], strides = [1, 1]} : vector<8x192xf32> to vector<8x32xf32>
    %193 = vector.extract_strided_slice %158 {offsets = [0, 3], sizes = [8, 1], strides = [1, 1]} : vector<8x4xf32> to vector<8x1xf32>
    %194 = vector.broadcast %193 : vector<8x1xf32> to vector<8x32xf32>
    %195 = arith.mulf %192, %194 : vector<8x32xf32>
    %196 = arith.addf %191, %195 : vector<8x32xf32>
    %197 = tpu.concatenate %177, %196 in 1 : vector<8x32xf32>, vector<8x32xf32> -> vector<8x64xf32>
    %c0_42 = arith.constant 0 : index
    %c0_43 = arith.constant 0 : index
    %198 = vector.load %arg14[%c0_42, %c0_43] : memref<64x64xf32, #tpu.memory_space<vmem>>, vector<64x64xf32>
    %cst_44 = arith.constant dense<0.000000e+00> : vector<8x64xf32>
    %199 = tpu.matmul %197, %198, %cst_44 {dimension_numbers = #tpu.dot_dimension_numbers<[1], [0], [0], [1], [0, 0, 1, 1], [], []>} : vector<8x64xf32>, vector<64x64xf32>, vector<8x64xf32> -> vector<8x64xf32>
    %c0_45 = arith.constant 0 : index
    %c0_46 = arith.constant 0 : index
    %200 = vector.load %arg15[%c0_45, %c0_46] : memref<1x64xf32, #tpu.memory_space<vmem>>, vector<1x64xf32>
    %201 = vector.broadcast %200 : vector<1x64xf32> to vector<8x64xf32>
    %202 = arith.addf %199, %201 : vector<8x64xf32>
    %cst_47 = arith.constant 0.000000e+00 : f32
    %203 = vector.broadcast %cst_47 : f32 to vector<8x64xf32>
    %204 = arith.maximumf %202, %203 : vector<8x64xf32>
    %c0_48 = arith.constant 0 : index
    %c0_49 = arith.constant 0 : index
    %205 = vector.load %arg16[%c0_48, %c0_49] : memref<64x2xf32, #tpu.memory_space<vmem>>, vector<64x2xf32>
    %cst_50 = arith.constant dense<0.000000e+00> : vector<8x2xf32>
    %206 = tpu.matmul %204, %205, %cst_50 {dimension_numbers = #tpu.dot_dimension_numbers<[1], [0], [0], [1], [0, 0, 1, 1], [], []>} : vector<8x64xf32>, vector<64x2xf32>, vector<8x2xf32> -> vector<8x2xf32>
    %c0_51 = arith.constant 0 : index
    %c0_52 = arith.constant 0 : index
    %207 = vector.load %arg17[%c0_51, %c0_52] : memref<1x2xf32, #tpu.memory_space<vmem>>, vector<1x2xf32>
    %208 = vector.broadcast %207 : vector<1x2xf32> to vector<8x2xf32>
    %209 = arith.addf %206, %208 : vector<8x2xf32>
    %c0_53 = arith.constant 0 : index
    %c0_54 = arith.constant 0 : index
    %210 = vector.load %arg18[%c0_53, %c0_54] : memref<8x2xf32, #tpu.memory_space<vmem>>, vector<8x2xf32>
    tpu.vector_store %arg18[%c0_53, %c0_54], %209 {strides = array<i32>} : memref<8x2xf32, #tpu.memory_space<vmem>>, vector<8x2xf32>,
    return
  }
  func.func @transform_0(%arg0: i32) -> (i32, i32) {
    %c0_i32 = arith.constant 0 : i32
    %c0_i32_0 = arith.constant 0 : i32
    %c0_i32_1 = arith.constant 0 : i32
    return %c0_i32, %c0_i32_0 : i32, i32
  }
  func.func @transform_1(%arg0: i32) -> (i32, i32) {
    %c0_i32 = arith.constant 0 : i32
    %c0_i32_0 = arith.constant 0 : i32
    %c0_i32_1 = arith.constant 0 : i32
    return %c0_i32, %c0_i32_0 : i32, i32
  }
  func.func @transform_2(%arg0: i32) -> (i32, i32) {
    %c0_i32 = arith.constant 0 : i32
    %c0_i32_0 = arith.constant 0 : i32
    %c0_i32_1 = arith.constant 0 : i32
    return %c0_i32, %c0_i32_0 : i32, i32
  }
  func.func @transform_3(%arg0: i32) -> (i32, i32) {
    %c0_i32 = arith.constant 0 : i32
    %c0_i32_0 = arith.constant 0 : i32
    %c0_i32_1 = arith.constant 0 : i32
    return %c0_i32, %c0_i32_0 : i32, i32
  }
  func.func @transform_4(%arg0: i32) -> (i32, i32) {
    %c0_i32 = arith.constant 0 : i32
    %c0_i32_0 = arith.constant 0 : i32
    %c0_i32_1 = arith.constant 0 : i32
    return %c0_i32, %c0_i32_0 : i32, i32
  }
  func.func @transform_5(%arg0: i32) -> (i32, i32) {
    %c0_i32 = arith.constant 0 : i32
    %c0_i32_0 = arith.constant 0 : i32
    %c0_i32_1 = arith.constant 0 : i32
    return %c0_i32, %c0_i32_0 : i32, i32
  }
  func.func @transform_6(%arg0: i32) -> (i32, i32) {
    %c0_i32 = arith.constant 0 : i32
    %c0_i32_0 = arith.constant 0 : i32
    %c0_i32_1 = arith.constant 0 : i32
    return %c0_i32, %c0_i32_0 : i32, i32
  }
  func.func @transform_7(%arg0: i32) -> (i32, i32) {
    %c0_i32 = arith.constant 0 : i32
    %c0_i32_0 = arith.constant 0 : i32
    %c0_i32_1 = arith.constant 0 : i32
    return %c0_i32, %c0_i32_0 : i32, i32
  }
  func.func @transform_8(%arg0: i32) -> (i32, i32) {
    %c0_i32 = arith.constant 0 : i32
    %c0_i32_0 = arith.constant 0 : i32
    %c0_i32_1 = arith.constant 0 : i32
    return %c0_i32, %c0_i32_0 : i32, i32
  }
  func.func @transform_9(%arg0: i32) -> (i32, i32) {
    %c0_i32 = arith.constant 0 : i32
    %c0_i32_0 = arith.constant 0 : i32
    %c0_i32_1 = arith.constant 0 : i32
    return %c0_i32, %c0_i32_0 : i32, i32
  }
  func.func @transform_10(%arg0: i32) -> (i32, i32) {
    %c0_i32 = arith.constant 0 : i32
    %c0_i32_0 = arith.constant 0 : i32
    %c0_i32_1 = arith.constant 0 : i32
    return %c0_i32, %c0_i32_0 : i32, i32
  }
  func.func @transform_11(%arg0: i32) -> (i32, i32) {
    %c0_i32 = arith.constant 0 : i32
    %c0_i32_0 = arith.constant 0 : i32
    %c0_i32_1 = arith.constant 0 : i32
    return %c0_i32, %c0_i32_0 : i32, i32
  }
  func.func @transform_12(%arg0: i32) -> (i32, i32) {
    %c0_i32 = arith.constant 0 : i32
    %c0_i32_0 = arith.constant 0 : i32
    %c0_i32_1 = arith.constant 0 : i32
    return %c0_i32, %c0_i32_0 : i32, i32
  }
  func.func @transform_13(%arg0: i32) -> (i32, i32) {
    %c0_i32 = arith.constant 0 : i32
    %c0_i32_0 = arith.constant 0 : i32
    %c0_i32_1 = arith.constant 0 : i32
    return %c0_i32, %c0_i32_0 : i32, i32
  }
  func.func @transform_14(%arg0: i32) -> (i32, i32) {
    %c0_i32 = arith.constant 0 : i32
    %c0_i32_0 = arith.constant 0 : i32
    %c0_i32_1 = arith.constant 0 : i32
    return %c0_i32, %c0_i32_0 : i32, i32
  }
  func.func @transform_15(%arg0: i32) -> (i32, i32) {
    %c0_i32 = arith.constant 0 : i32
    %c0_i32_0 = arith.constant 0 : i32
    %c0_i32_1 = arith.constant 0 : i32
    return %c0_i32, %c0_i32_0 : i32, i32
  }
  func.func @transform_16(%arg0: i32) -> (i32, i32) {
    %c0_i32 = arith.constant 0 : i32
    %c0_i32_0 = arith.constant 0 : i32
    %c0_i32_1 = arith.constant 0 : i32
    return %c0_i32, %c0_i32_0 : i32, i32
  }
  func.func @transform_17(%arg0: i32) -> (i32, i32) {
    %c0_i32 = arith.constant 0 : i32
    %c0_i32_0 = arith.constant 0 : i32
    %c0_i32_1 = arith.constant 0 : i32
    return %c0_i32, %c0_i32_0 : i32, i32
  }
}

</mosaic_0001>

<bundles_post_ra>
// kernel: ple_original_forward.1
= control target key start
LH: loop header
LB: loop body
LE: loop exit
PB: predicated region body
PF: predicated region fallthrough
CT: control target
= control target key end

     0   :  { %s1914_s0 = inlined_call_operand.vmem [shape: f32[8,34], index: 0, kind: input, shape index: {}]   ;;  %s1915_s1 = inlined_call_operand.vmem [shape: f32[34,192], index: 1, kind: input, shape index: {}]   ;;  %s1916_s2 = inlined_call_operand.vmem [shape: f32[1,192], index: 2, kind: input, shape index: {}]   ;;  %s1917_s3 = inlined_call_operand.hbm [shape: f32[192,192], index: 3, kind: input, shape index: {}]   ;;  %s1918_s4 = inlined_call_operand.vmem [shape: f32[1,192], index: 4, kind: input, shape index: {}]   ;;  %s1919_s5 = inlined_call_operand.vmem [shape: f32[34,14], index: 5, kind: input, shape index: {}]   ;;  %s1920_s6 = inlined_call_operand.vmem [shape: f32[1,14], index: 6, kind: input, shape index: {}]   ;;  %s1921_s7 = inlined_call_operand.vmem [shape: f32[96,192], index: 7, kind: input, shape index: {}]   ;;  %s1922_s8 = inlined_call_operand.vmem [shape: f32[1,192], index: 8, kind: input, shape index: {}]   ;;  %s1923_s9 = inlined_call_operand.hbm [shape: f32[192,192], index: 9, kind: input, shape index: {}]   ;;  %s1924_s10 = inlined_call_operand.vmem [shape: f32[1,192], index: 10, kind: input, shape index: {}]   ;;  %s1925_s11 = inlined_call_operand.vmem [shape: f32[64,8], index: 11, kind: input, shape index: {}]   ;;  %s1926_s12 = inlined_call_operand.vmem [shape: f32[1,8], index: 12, kind: input, shape index: {}]   ;;  %s1927_s13 = inlined_call_operand.vmem [shape: f32[64,64], index: 13, kind: input, shape index: {}]   ;;  %s1928_s14 = inlined_call_operand.vmem [shape: f32[1,64], index: 14, kind: input, shape index: {}]   ;;  %s1929_s15 = inlined_call_operand.vmem [shape: f32[64,2], index: 15, kind: input, shape index: {}]   ;;  %s1930_s16 = inlined_call_operand.vmem [shape: f32[1,2], index: 16, kind: input, shape index: {}]   ;;  %s1931_s17 = inlined_call_operand.vmem [shape: f32[8,2], index: 17, kind: output, shape index: {}]  }
   0x1   :  { %1933 = sst [smem:[#allocation8_spill]] %s1914_s0 }
   0x2   :  { %1934 = sst [smem:[#allocation9_spill]] %s1915_s1 }
   0x3   :  { %22 = vsyncpa [#allocation3], 0 }
   0x4   :  { %23 = vsyncpa [#allocation5], 0  ;;  %s1436_s24 = smov [#allocation2]  }
   0x5   :  { %s35_s25 = sshll.u32 %s1436_s24, 4  ;;  %s36_s25 = int_to_ptr.vmem [resolvable:$true] %s35_s25 }
   0x6   :  { %s1400_s26 = scalar_lea.vmem %s36_s25, 6144  ;;  %p1405_p1 = scmp.lt.s32.totalorder %s36_s25, %s36_s25 }
   0x7   :  { %p1401_p0 = scmp.ne.s32.totalorder %s36_s25, %s1400_s26  ;;  %p1406_p2 = scmp.lt.s32.totalorder %s1400_s26, %s1400_s26 }
   0x9   :  { %p1407_p3 = por %p1406_p2, %p1405_p1 }
   0xb   :  { %p1408_p4 = pnand %p1407_p3, %p1401_p0 }
   0xd   :  { %1411 = shalt.err (!%p1408_p4)
}
   0xe   :  { %s1437_s27 = smov 256   ;;  %s1438_s28 = smov 16  }
   0xf   :  { %41 = dma.hbm_to_vmem [thread:$0]  %s1917_s3, 6144, %s36_s25, [#allocation3], %s1437_s27, %s1437_s27, %s1438_s28  }
  0x10   :  { %s1439_s30 = smov [#allocation4]  }
  0x11   :  { %s57_s18 = sshll.u32 %s1439_s30, 4  ;;  %s58_s18 = int_to_ptr.vmem [resolvable:$true] %s57_s18 }
  0x12   :  { %s1420_s19 = scalar_lea.vmem %s58_s18, 6144  ;;  %p1425_p6 = scmp.lt.s32.totalorder %s58_s18, %s58_s18 }
  0x13   :  { %p1421_p5 = scmp.ne.s32.totalorder %s58_s18, %s1420_s19  ;;  %p1426_p7 = scmp.lt.s32.totalorder %s1420_s19, %s1420_s19 }
  0x15   :  { %p1427_p8 = por %p1426_p7, %p1425_p6 }
  0x17   :  { %p1428_p9 = pnand %p1427_p8, %p1421_p5 }
  0x19   :  { %1431 = shalt.err (!%p1428_p9)
}
  0x1a   :  { %63 = dma.hbm_to_vmem [thread:$0]  %s1923_s9, 6144, %s58_s18, [#allocation5], %s1437_s27, %s1437_s27, %s1438_s28  }
  0x1b   :  { %1432 = dma.done.wait [#allocation3], 6144  }
  0x1c   :  { %1433 = vsyncadd [#allocation3], 4294961152 }
  0x1d   :  { %1434 = dma.done.wait [#allocation5], 6144  }
  0x1e   :  { %1435 = vsyncadd [#allocation5], 4294961152  ;;  %v1440_v0 = vmov 0.0   ;;  %vm111_vm0 = vcmask 1041408   ;;  %s1935_s22 = sld [smem:[#allocation9_spill]]  ;;  %v222_v9 = vld [vmem:[#allocation2 + $0xf8] sm:$0xff] }
  0x1f   :  { %182 = vmatprep.mubr.f32.mxu0 %v1440_v0  ;;  %v221_v10 = vld [vmem:[#allocation2 + $0xf0] sm:$0xff]  ;;  %255 = vmatprep.subr.mxu1 %v222_v9  ;;  %v220_v12 = vld [vmem:[#allocation2 + $0xe8] sm:$0xff]  ;;  %v219_v13 = vld [vmem:[#allocation2 + $0xe0] sm:$0xff]  ;;  %s1936_s9 = sld [smem:[#allocation8_spill]]  ;;  %vm107_vm1 = vcmask 277504   ;;  %vm1441_vm2 = vmmov 0  }
  0x20   :  { %256 = vmatpush1.msra.mxu1 %v221_v10  ;;  %v218_v15 = vld [vmem:[#allocation2 + $0xd8] sm:$0xff]  ;;  %v330_v17 = vld [vmem:[%s1919_s5 + $0x20] sm:$0x3]  ;;  %v217_v18 = vld [vmem:[#allocation2 + $0xd0] sm:$0xff]  ;;  %vm251_vm3 = vcmask 523264   ;;  %vm439_vm4 = vcmask 113728  }
  0x21   :  { %257 = vmatprep.subr.mxu1 %v220_v12  ;;  %v329_v19 = vld [vmem:[%s1919_s5 + $0x18] sm:$0xff]  ;;  %v216_v20 = vld [vmem:[#allocation2 + $0xc8] sm:$0xff]  ;;  %v215_v21 = vld [vmem:[#allocation2 + $0xc0] sm:$0xff]  ;;  %vm423_vm5 = vcmask 64544   ;;  %vm411_vm6 = vcmask 31744   ;;  %vm450_vm7 = vcmask 48128  }
  0x22   :  { %258 = vmatpush1.msra.mxu1 %v219_v13  ;;  %v328_v22 = vld [vmem:[%s1919_s5 + $0x10] sm:$0xff]  ;;  %v214_v23 = vld [vmem:[#allocation2 + $0xb8] sm:$0xff]  ;;  %v327_v25 = vld [vmem:[%s1919_s5 + $0x8] sm:$0xff]  ;;  %s1452_s26 = smov 96   ;;  %vm580_vm8 = vcmask 261120   ;;  %vm623_vm9 = vcmask 785408  }
  0x23   :  { %259 = vmatprep.subr.mxu1 %v218_v15  ;;  %v213_v24 = vld [vmem:[#allocation2 + $0xb0] sm:$0xff]  ;;  %v212_v26 = vld [vmem:[#allocation2 + $0xa8] sm:$0xff]  ;;  %v211_v27 = vld [vmem:[#allocation2 + $0xa0] sm:$0xff]  ;;  %vm1198_vm10 = vcmask 15360  }
  0x24   :  { %v94_v1 = vld [vmem:[%s1935_s22 + $0x48] sm:$0x3]  ;;  %v93_v2 = vld [vmem:[%s1935_s22 + $0x40] sm:$0x3]  ;;  %v92_v3 = vld [vmem:[%s1935_s22 + $0x38] sm:$0xff]  ;;  %260 = vmatpush1.msra.mxu1 %v217_v18 }
  0x25   :  { %1206 = vmatprep.subr.msk.mxu0 %vm111_vm0, %v94_v1  ;;  %v91_v4 = vld [vmem:[%s1935_s22 + $0x30] sm:$0xff]  ;;  %v90_v5 = vld [vmem:[%s1935_s22 + $0x28] sm:$0xff]  ;;  %v89_v6 = vld [vmem:[%s1935_s22 + $0x20] sm:$0xff]  ;;  %261 = vmatprep.subr.mxu1 %v216_v20 }
  0x26   :  { %1207 = vmatpush1.msk.msra.mxu0 %vm111_vm0, %v93_v2  ;;  %v88_v7 = vld [vmem:[%s1935_s22 + $0x18] sm:$0xff]  ;;  %v87_v8 = vld [vmem:[%s1935_s22 + $0x10] sm:$0xff]  ;;  %v86_v11 = vld [vmem:[%s1935_s22 + $0x8] sm:$0xff]  ;;  %262 = vmatpush1.msra.mxu1 %v215_v21  ;;  %v97_v2 = vlaneseq }
  0x27   :  { %142 = vmatprep.subr.mxu0 %v92_v3  ;;  %v85_v14 = vld [vmem:[%s1935_s22] sm:$0xff]  ;;  %263 = vmatprep.subr.mxu1 %v214_v23  ;;  %v210_v29 = vld [vmem:[#allocation2 + $0x98] sm:$0xff]  ;;  %v209_v30 = vld [vmem:[#allocation2 + $0x90] sm:$0xff] }
  0x28   :  { %143 = vmatpush1.msra.mxu0 %v91_v4  ;;  %v84_v16 = vld [vmem:[%s1936_s9] sm:$0xff]  ;;  %264 = vmatpush1.msra.mxu1 %v213_v24  ;;  %v208_v31 = vld [vmem:[#allocation2 + $0x88] sm:$0xff]  ;;  %v206_v33 = vld [vmem:[#allocation2 + $0x78] sm:$0xff]  ;;  %v98_v3 = vshrl.u32 %v97_v2, 7  ;;  %s1454_s9 = smov 32  }
  0x29   :  { %144 = vmatprep.subr.mxu0 %v90_v5  ;;  %v326_v28 = vld [vmem:[%s1919_s5] sm:$0xff]  ;;  %265 = vmatprep.subr.mxu1 %v212_v26  ;;  %v205_v34 = vld [vmem:[#allocation2 + $0x70] sm:$0xff]  ;;  %v204_v35 = vld [vmem:[#allocation2 + $0x68] sm:$0xff] }
  0x2a   :  { %145 = vmatpush1.msra.mxu0 %v89_v6  ;;  %266 = vmatpush1.msra.mxu1 %v211_v27  ;;  %v207_v32 = vld [vmem:[#allocation2 + $0x80] sm:$0xff]  ;;  %v202_v37 = vld [vmem:[#allocation2 + $0x58] sm:$0xff]  ;;  %v201_v38 = vld [vmem:[#allocation2 + $0x50] sm:$0xff]  ;;  %v1620_v4 = vsub.s32 0, %v98_v3  ;;  %v1625_v6 = vsub.s32 1, %v98_v3 }
  0x2b   :  { %146 = vmatprep.subr.mxu0 %v88_v7  ;;  %267 = vmatprep.subr.mxu1 %v210_v29  ;;  %v203_v36 = vld [vmem:[#allocation2 + $0x60] sm:$0xff]  ;;  %v200_v39 = vld [vmem:[#allocation2 + $0x48] sm:$0xff]  ;;  %v198_v41 = vld [vmem:[#allocation2 + $0x38] sm:$0xff] }
  0x2c   :  { %147 = vmatpush1.msra.mxu0 %v87_v8  ;;  %268 = vmatpush1.msra.mxu1 %v209_v30  ;;  %v199_v40 = vld [vmem:[#allocation2 + $0x40] sm:$0xff]  ;;  %v197_v42 = vld [vmem:[#allocation2 + $0x30] sm:$0xff]  ;;  %v196_v43 = vld [vmem:[#allocation2 + $0x28] sm:$0xff] }
  0x2d   :  { %148 = vmatprep.subr.mxu0 %v86_v11  ;;  %269 = vmatprep.subr.mxu1 %v208_v31  ;;  %v195_v44 = vld [vmem:[#allocation2 + $0x20] sm:$0xff]  ;;  %v194_v45 = vld [vmem:[#allocation2 + $0x18] sm:$0xff]  ;;  %v193_v46 = vld [vmem:[#allocation2 + $0x10] sm:$0xff] }
  0x2e   :  { %149 = vmatpush1.msra.mxu0 %v85_v14  ;;  %270 = vmatpush1.msra.mxu1 %v207_v32  ;;  %v192_v47 = vld [vmem:[#allocation2 + $0x8] sm:$0xff]  ;;  %v191_v48 = vld [vmem:[#allocation2] sm:$0xff]  ;;  %v238_v49 = vld [vmem:[#allocation2 + $0x178] sm:$0xff]  ;;  %v1443_v32 = vmov 1  }
  0x2f   :  { %1208 = vmatmul.mubr.msk.f32.vlgmr.msra.gmra.mxu0 %vm107_vm1, %v84_v16  ;;  %1254 = vmatprep.subr.mxu0 %v1440_v0  ;;  %v237_v50 = vld [vmem:[#allocation2 + $0x170] sm:$0xff]  ;;  %v236_v51 = vld [vmem:[#allocation2 + $0x168] sm:$0xff]  ;;  %v235_v52 = vld [vmem:[#allocation2 + $0x160] sm:$0xff] }
  0x30   :  { %1255 = vmatpush3.msk.msra.mxu0 %vm111_vm0, %v330_v17  ;;  %1264 = vmatprep.mubr.msk.f32.mxu0 %vm1441_vm2, %v1440_v0  ;;  %v234_v53 = vld [vmem:[#allocation2 + $0x158] sm:$0xff]  ;;  %v233_v54 = vld [vmem:[#allocation2 + $0x150] sm:$0xff]  ;;  %v232_v55 = vld [vmem:[#allocation2 + $0x148] sm:$0xff] }
  0x31   :  { %1256 = vmatprep.subr.mxu0 %v1440_v0  ;;  %271 = vmatprep.subr.mxu1 %v206_v33  ;;  %v231_v56 = vld [vmem:[#allocation2 + $0x140] sm:$0xff]  ;;  %v230_v57 = vld [vmem:[#allocation2 + $0x138] sm:$0xff]  ;;  %v229_v58 = vld [vmem:[#allocation2 + $0x130] sm:$0xff] }
  0x32   :  { %1257 = vmatpush3.msra.mxu0 %v329_v19  ;;  %272 = vmatpush1.msra.mxu1 %v205_v34  ;;  %v228_v59 = vld [vmem:[#allocation2 + $0x128] sm:$0xff]  ;;  %v227_v60 = vld [vmem:[#allocation2 + $0x120] sm:$0xff]  ;;  %v226_v61 = vld [vmem:[#allocation2 + $0x118] sm:$0xff] }
  0x33   :  { %1258 = vmatprep.subr.mxu0 %v1440_v0  ;;  %273 = vmatprep.subr.mxu1 %v204_v35  ;;  %v225_v62 = vld [vmem:[#allocation2 + $0x110] sm:$0xff]  ;;  %v224_v63 = vld [vmem:[#allocation2 + $0x108] sm:$0xff]  ;;  %v223_v1 = vld [vmem:[#allocation2 + $0x100] sm:$0xff] }
  0x34   :  { %1259 = vmatpush3.msra.mxu0 %v328_v22  ;;  %274 = vmatpush1.msra.mxu1 %v203_v36  ;;  %v95_v5 = vld [vmem:[%s1916_s2] sm:$0x3]  ;;  %s1442_s2 = smov 124  }
  0x35   :  { %1260 = vmatprep.subr.mxu0 %v1440_v0  ;;  %275 = vmatprep.subr.mxu1 %v202_v37  ;;  %v100_v7 = vrot.slane %v95_v5, %v1620_v4  ;;  %v104_v8 = vrot.slane %v95_v5, %v1625_v6  ;;  %v1210_v15 = vld [vmem:[%s1920_s6] ss:$0 sm:$0xff]  ;;  %v1444_v37 = vmov 5   ;;  %s1445_s6 = smov 120  }
  0x36   :  { %1261 = vmatpush3.msra.mxu0 %v327_v25  ;;  %276 = vmatpush1.msra.mxu1 %v201_v38 }
  0x37   :  { %1262 = vmatprep.subr.mxu0 %v1440_v0  ;;  %277 = vmatprep.subr.mxu1 %v200_v39 }
  0x38   :  { %1263 = vmatpush3.msra.mxu0 %v326_v28  ;;  %278 = vmatpush1.msra.mxu1 %v199_v40 }
  0x39   :  { %1265 = vmatmul.mubr.msk.f32.vlgmr.msra.gmra.mxu0 %vm107_vm1, %v84_v16  ;;  %279 = vmatprep.subr.mxu1 %v198_v41 }
  0x3a   :  { %691 = vmatprep.mubr.f32.mxu0 %v1440_v0  ;;  %280 = vmatpush1.msra.mxu1 %v197_v42 }
  0x3b   :  { %281 = vmatprep.subr.mxu1 %v196_v43  ;;  %1352 = vset.pattern.permute.xlu0 %v1443_v32 }
  0x3c   :  { %282 = vmatpush1.msra.mxu1 %v195_v44  ;;  %1349 = vset.pattern.permute.xlu1 %v1444_v37 }
  0x3d   :  { %283 = vmatprep.subr.mxu1 %v194_v45  ;;  %v1446_v45 = vmov 6  }
  0x3e   :  { %284 = vmatpush1.msra.mxu1 %v193_v46  ;;  %v1447_v46 = vmov 7  }
  0x3f   :  { %285 = vmatprep.subr.mxu1 %v192_v47  ;;  %v1448_v47 = vmov 4  }
  0x40   :  { %286 = vmatpush1.msra.mxu1 %v191_v48 }
  0x41   :  { %303 = vmatprep.subr.mxu1 %v238_v49 }
  0x42   :  { %304 = vmatpush2.msra.mxu1 %v237_v50  ;;  %v1449_v50 = vmov 3  }
  0x43   :  { %305 = vmatprep.subr.mxu1 %v236_v51  ;;  %v1450_v51 = vmov 9  }
  0x44   :  { %306 = vmatpush2.msra.mxu1 %v235_v52  ;;  %v1451_v52 = vmov 10  }
  0x45   :  { %307 = vmatprep.subr.mxu1 %v234_v53  ;;  %v239_v53 = vld [vmem:[%s1918_s4] sm:$0x3]  ;;  %s1453_s4 = smov 64  }
  0x46   :  { %308 = vmatpush2.msra.mxu1 %v233_v54  ;;  %v244_v54 = vrot.slane %v239_v53, %v1620_v4 }
  0x47   :  { %309 = vmatprep.subr.mxu1 %v232_v55 }
  0x48   :  { %310 = vmatpush2.msra.mxu1 %v231_v56 }
  0x49   :  { %311 = vmatprep.subr.mxu1 %v230_v57  ;;  %v248_v57 = vrot.slane %v239_v53, %v1625_v6  ;;  %v602_v53 = vld [vmem:[%s1921_s7 + $0x78] sm:$0xff] }
  0x4a   :  { %312 = vmatpush2.msra.mxu1 %v229_v58 }
  0x4b   :  { %313 = vmatprep.subr.mxu1 %v228_v59 }
  0x4c   :  { %314 = vmatpush2.msra.mxu1 %v227_v60 }
  0x4d   :  { %315 = vmatprep.subr.mxu1 %v226_v61 }
  0x4e   :  { %316 = vmatpush2.msra.mxu1 %v225_v62 }
  0x4f   :  { %317 = vmatprep.subr.mxu1 %v224_v63 }
  0x50   :  { %318 = vmatpush2.msra.mxu1 %v223_v1 }
  0x51   :  { %1267 = vmatprep.subr.mxu1 %v1440_v0 }
  0xef   :  { %v184_v9 = vpop.f32.mrf.mxu0 }
  0xf0   :  { %v185_v10 = vadd.f32 %v184_v9, %v100_v7  ;;  %v1455_v9 = vmov 13  }
  0xf1   :  { %v186_v11 = vpop.f32.mrf.mxu0 }
  0xf2   :  { %v187_v12 = vadd.f32 %v186_v11, %v104_v8  ;;  %v189_v14 = vmax.f32 %v185_v10, 0.0  ;;  %v1456_v10 = vmov 11  }
  0xf4   :  { %v190_v13 = vmax.f32 %v187_v12, 0.0 }
  0xf6   :  { %1209 = vmatprep.mubr.msk.f32.mxu1 %vm251_vm3, %v190_v13  ;;  %v1457_v13 = vmov 0  }
  0xf7   :  { %320 = vmatmul.mubr.f32.vlgmr.msra.gmra.mxu1 %v189_v14  ;;  %v1458_v14 = vmov 12  }
  0xf8   :  { %1283 = vmatprep.mubr.msk.f32.mxu1 %vm1441_vm2, %v1440_v0 }
  0xf9   :  { %v407_v16 = vpop.f32.mrf.mxu0 }
  0xfa   :  { %v408_v17 = vadd.f32 %v1210_v15, %v407_v16  ;;  %v1459_v16 = vmov 2  }
  0xfb   :  { %v1266_v18 = vpop.f32.mrf.mxu0 }
  0xfc   :  { %v440_v19 = vsel %vm439_vm4, %v408_v17, -inf  ;;  %v424_v20 = vsel %vm423_vm5, %v408_v17, -inf  ;;  %v412_v21 = vsel %vm411_vm6, %v408_v17, -inf  ;;  %v841_v18 = vld [vmem:[%s1925_s11 + $0x38] sm:$0xff] }
  0xfd   :  { %441 = vmax.xlane.f32.xlu1 %v440_v19  ;;  %425 = vmax.xlane.f32.xlu0 %v424_v20  ;;  %v840_v19 = vld [vmem:[%s1925_s11 + $0x30] sm:$0xff]  ;;  %v1460_v20 = vmov 8  }
  0xfe   :  { %1268 = vmatpush3.msra.mxu1 %v841_v18  ;;  %v592_v18 = vld [vmem:[%s1921_s7 + $0x28] sm:$0xff] }
  0xff   :  { %1269 = vmatprep.subr.mxu1 %v1440_v0 }
 0x100   :  { %1270 = vmatpush3.msra.mxu1 %v840_v19  ;;  %v591_v19 = vld [vmem:[%s1921_s7 + $0x20] sm:$0xff] }
 0x101   :  { %413 = vmax.xlane.f32.xlu1 %v412_v21  ;;  %v839_v21 = vld [vmem:[%s1925_s11 + $0x28] sm:$0xff]  ;;  %1271 = vmatprep.subr.mxu1 %v1440_v0 }
 0x102   :  { %1272 = vmatpush3.msra.mxu1 %v839_v21 }
 0x103   :  { %1273 = vmatprep.subr.mxu1 %v1440_v0 }
 0x186   :  { %v426_v22 = vpop.xlane.xlu0 %425  ;;  %v442_v25 = vpop.xlane.xlu1 %441 }
 0x187   :  { %v427_v23 = vsub.f32 %v408_v17, %v426_v22  ;;  %v443_v33 = vsub.f32 %v408_v17, %v442_v25  ;;  %v838_v22 = vld [vmem:[%s1925_s11 + $0x20] sm:$0xff]  ;;  %v835_v25 = vld [vmem:[%s1925_s11 + $0x8] sm:$0xff] }
 0x188   :  { %1274 = vmatpush3.msra.mxu1 %v838_v22  ;;  %v589_v22 = vld [vmem:[%s1921_s7 + $0x10] sm:$0xff] }
 0x189   :  { %v428_v24 = vmul.f32 1.442695, %v427_v23  ;;  %v444_v35 = vmul.f32 1.442695, %v443_v33  ;;  %v837_v23 = vld [vmem:[%s1925_s11 + $0x18] sm:$0xff]  ;;  %1275 = vmatprep.subr.mxu1 %v1440_v0 }
 0x18a   :  { %v414_v27 = vpop.xlane.xlu1 %413  ;;  %1276 = vmatpush3.msra.mxu1 %v837_v23  ;;  %v588_v23 = vld [vmem:[%s1921_s7 + $0x8] sm:$0xff] }
 0x18b   :  { %1372 = vpow2.f32 %v428_v24  ;;  %v415_v28 = vsub.f32 %v408_v17, %v414_v27  ;;  %v836_v24 = vld [vmem:[%s1925_s11 + $0x10] sm:$0xff]  ;;  %1277 = vmatprep.subr.mxu1 %v1440_v0 }
 0x18c   :  { %1278 = vmatpush3.msra.mxu1 %v836_v24  ;;  %v587_v24 = vld [vmem:[%s1921_s7] sm:$0xff] }
 0x18d   :  { %v416_v29 = vmul.f32 1.442695, %v415_v28  ;;  %1279 = vmatprep.subr.mxu1 %v1440_v0 }
 0x18e   :  { %1280 = vmatpush3.msra.mxu1 %v835_v25 }
 0x18f   :  { %1374 = vpow2.f32 %v416_v29  ;;  %1281 = vmatprep.subr.mxu1 %v1440_v0 }
 0x190   :  { %1376 = vpow2.f32 %v444_v35 }
 0x198   :  { %v1373_v26 = vpop.eup %1372 }
 0x199   :  { %431 = vrot.lane.b32.xlu0 %v1373_v26, %s1442_s2 }
 0x19c   :  { %v1375_v30 = vpop.eup %1374 }
 0x19d   :  { %v418_v31 = vsel %vm411_vm6, %v1375_v30, 0.0  ;;  %v1377_v38 = vpop.eup %1376 }
 0x1b7   :  { %v321_v55 = vpop.f32.mrf.mxu1 }
 0x1b8   :  { %419 = vadd.xlane.f32.xlu0 %v418_v31  ;;  %v1654_v56 = vadd.f32 %v321_v55, %v244_v54  ;;  %v601_v55 = vld [vmem:[%s1921_s7 + $0x70] sm:$0xff] }
 0x1b9   :  { %v323_v59 = vpop.f32.mrf.mxu1 }
 0x1ba   :  { %v1659_v61 = vadd.f32 %v323_v59, %v248_v57  ;;  %v600_v57 = vld [vmem:[%s1921_s7 + $0x68] sm:$0xff]  ;;  %v598_v59 = vld [vmem:[%s1921_s7 + $0x58] sm:$0xff] }
 0x20b   :  { %v432_v34 = vpop.permute.xlu0 %431 }
 0x20c   :  { %v434_v36 = vsel %vm411_vm6, %v432_v34, 0.0 }
 0x20d   :  { %435 = vadd.xlane.f32.xlu1 %v434_v36 }
 0x21e   :  { %447 = vrot.lane.b32.xlu1 %v1377_v38, %s1445_s6 }
 0x241   :  { %v420_v39 = vpop.xlane.xlu0 %419 }
 0x242   :  { %1378 = vrcp.f32 %v420_v39  ;;  %v609_v39 = vld [vmem:[%s1921_s7 + $0xb0] sm:$0xff] }
 0x24f   :  { %v1379_v40 = vpop.eup %1378 }
 0x250   :  { %v1642_v41 = vmul.f32 %v1379_v40, %v1375_v30  ;;  %v608_v40 = vld [vmem:[%s1921_s7 + $0xa8] sm:$0xff] }
 0x252   :  { %463 = vperm.xlu0 %1352, %v1642_v41  }
 0x256   :  { %1355 = vset.pattern.permute.xlu0 %v1450_v51  ;;  %v604_v51 = vld [vmem:[%s1921_s7 + $0x88] sm:$0xff] }
 0x296   :  { %v436_v42 = vpop.xlane.xlu1 %435 }
 0x297   :  { %1380 = vrcp.f32 %v436_v42  ;;  %v606_v42 = vld [vmem:[%s1921_s7 + $0x98] sm:$0xff] }
 0x29a   :  { %v448_v48 = vpop.permute.xlu1 %447 }
 0x29b   :  { %v451_v49 = vsel %vm450_vm7, %v448_v48, 0.0 }
 0x2a4   :  { %v1381_v43 = vpop.eup %1380 }
 0x2a5   :  { %v438_v44 = vmul.f32 %v1381_v43, %v1373_v26  ;;  %v834_v26 = vld [vmem:[%s1925_s11] sm:$0xff] }
 0x2a6   :  { %1282 = vmatpush3.msra.mxu1 %v834_v26 }
 0x2a7   :  { %495 = vperm.xlu1 %1349, %v438_v44   ;;  %1286 = vmatprep.subr.mxu1 %v1440_v0 }
 0x2ab   :  { %1350 = vset.pattern.permute.xlu1 %v1446_v45 }
 0x2ac   :  { %505 = vperm.xlu1 %1350, %v438_v44  }
 0x2b0   :  { %1351 = vset.pattern.permute.xlu1 %v1447_v46 }
 0x2b1   :  { %515 = vperm.xlu1 %1351, %v438_v44  }
 0x2b5   :  { %1353 = vset.pattern.permute.xlu1 %v1448_v47 }
 0x2cd   :  { %v464_v8 = vpop.permute.xlu0 %463 }
 0x2ce   :  { %v466_v11 = vmul.f32 %v464_v8, %v1654_v56 }
 0x2d5   :  { %452 = vadd.xlane.f32.xlu1 %v451_v49 }
 0x2e6   :  { %490 = vperm.xlu1 %1353, %v438_v44  }
 0x2ea   :  { %1354 = vset.pattern.permute.xlu1 %v1449_v50 }
 0x2eb   :  { %479 = vperm.xlu1 %1354, %v1642_v41  }
 0x2ef   :  { %1356 = vset.pattern.permute.xlu1 %v1451_v52  ;;  %v603_v52 = vld [vmem:[%s1921_s7 + $0x80] sm:$0xff] }
 0x322   :  { %v496_v58 = vpop.permute.xlu1 %495 }
 0x323   :  { %v498_v60 = vmul.f32 %v496_v58, %v1654_v56  ;;  %v599_v58 = vld [vmem:[%s1921_s7 + $0x60] sm:$0xff] }
 0x325   :  { %500 = vrot.lane.b32.xlu1 %v498_v60, %s1452_s26  ;;  %v597_v60 = vld [vmem:[%s1921_s7 + $0x50] sm:$0xff] }
 0x327   :  { %v506_v62 = vpop.permute.xlu1 %505 }
 0x328   :  { %v508_v63 = vmul.f32 %v506_v62, %v1659_v61  ;;  %v596_v62 = vld [vmem:[%s1921_s7 + $0x48] sm:$0xff] }
 0x32a   :  { %510 = vrot.lane.b32.xlu0 %v508_v63, %s1453_s4  ;;  %v595_v63 = vld [vmem:[%s1921_s7 + $0x40] sm:$0xff] }
 0x32c   :  { %v516_v1 = vpop.permute.xlu1 %515 }
 0x32d   :  { %v518_v2 = vmul.f32 %v516_v1, %v1659_v61  ;;  %v594_v1 = vld [vmem:[%s1921_s7 + $0x38] sm:$0xff] }
 0x32f   :  { %520 = vrot.lane.b32.xlu1 %v518_v2, %s1454_s9 }
 0x35e   :  { %v453_v3 = vpop.xlane.xlu1 %452 }
 0x35f   :  { %1382 = vrcp.f32 %v453_v3 }
 0x362   :  { %v491_v12 = vpop.permute.xlu1 %490 }
 0x363   :  { %v493_v28 = vmul.f32 %v491_v12, %v1654_v56 }
 0x366   :  { %v480_v15 = vpop.permute.xlu1 %479 }
 0x367   :  { %v482_v17 = vmul.f32 %v480_v15, %v1659_v61 }
 0x36c   :  { %v1383_v5 = vpop.eup %1382 }
 0x36d   :  { %v455_v7 = vmul.f32 %v1383_v5, %v1377_v38  ;;  %v610_v38 = vld [vmem:[%s1921_s7 + $0xb8] sm:$0xff] }
 0x36e   :  { %635 = vmatprep.subr.mxu0 %v610_v38  ;;  %v1215_v38 = vld [vmem:[%s1926_s12] ss:$0 sm:$0xff] }
 0x36f   :  { %531 = vperm.xlu0 %1355, %v455_v7   ;;  %541 = vperm.xlu1 %1356, %v455_v7  }
 0x370   :  { %636 = vmatpush1.msra.mxu0 %v609_v39 }
 0x371   :  { %637 = vmatprep.subr.mxu0 %v608_v40 }
 0x373   :  { %1358 = vset.pattern.permute.xlu0 %v1455_v9  ;;  %1357 = vset.pattern.permute.xlu1 %v1456_v10 }
 0x374   :  { %567 = vperm.xlu0 %1358, %v455_v7   ;;  %551 = vperm.xlu1 %1357, %v455_v7  }
 0x378   :  { %1359 = vset.pattern.permute.xlu1 %v1457_v13  ;;  %468 = vrot.lane.b32.xlu0 %v466_v11, %s1452_s26 }
 0x379   :  { %458 = vperm.xlu1 %1359, %v1642_v41   ;;  %1362 = vset.pattern.permute.xlu0 %v1458_v14 }
 0x37d   :  { %1360 = vset.pattern.permute.xlu1 %v1459_v16 }
 0x37e   :  { %473 = vperm.xlu1 %1360, %v1642_v41   ;;  %v607_v41 = vld [vmem:[%s1921_s7 + $0xa0] sm:$0xff] }
 0x37f   :  { %638 = vmatpush1.msra.mxu0 %v607_v41 }
 0x380   :  { %639 = vmatprep.subr.mxu0 %v606_v42 }
 0x382   :  { %484 = vrot.lane.b32.xlu1 %v482_v17, %s1452_s26  ;;  %v593_v17 = vld [vmem:[%s1921_s7 + $0x30] sm:$0xff] }
 0x383   :  { %1361 = vset.pattern.permute.xlu1 %v1460_v20  ;;  %v590_v20 = vld [vmem:[%s1921_s7 + $0x18] sm:$0xff] }
 0x386   :  { %526 = vperm.xlu1 %1361, %v455_v7  }
 0x38a   :  { %1363 = vset.pattern.permute.xlu1 %v1444_v37 }
 0x397   :  { %v501_v27 = vpop.permute.xlu1 %500 }
 0x398   :  { %v503_v30 = vadd.f32 %v501_v27, %v493_v28 }
 0x39c   :  { %v511_v29 = vpop.permute.xlu0 %510 }
 0x39d   :  { %v513_v31 = vadd.f32 %v511_v29, %v503_v30 }
 0x3a1   :  { %v521_v33 = vpop.permute.xlu1 %520 }
 0x3a2   :  { %v523_v34 = vadd.f32 %v521_v33, %v513_v31 }
 0x3a4   :  { %577 = vrot.lane.b32.xlu0 %v523_v34, %s1452_s26 }
 0x3a8   :  { %561 = vperm.xlu0 %1362, %v455_v7  }
 0x3ac   :  { %1364 = vset.pattern.permute.xlu0 %v1446_v45  ;;  %v605_v45 = vld [vmem:[%s1921_s7 + $0x90] sm:$0xff] }
 0x3ad   :  { %640 = vmatpush1.msra.mxu0 %v605_v45  ;;  %v729_v45 = vld [vmem:[#allocation4 + $0xe8] sm:$0xff] }
 0x3ae   :  { %641 = vmatprep.subr.mxu0 %v604_v51  ;;  %v726_v51 = vld [vmem:[#allocation4 + $0xd0] sm:$0xff] }
 0x3af   :  { %642 = vmatpush1.msra.mxu0 %v603_v52  ;;  %v725_v52 = vld [vmem:[#allocation4 + $0xc8] sm:$0xff] }
 0x3b0   :  { %643 = vmatprep.subr.mxu0 %v602_v53  ;;  %v724_v53 = vld [vmem:[#allocation4 + $0xc0] sm:$0xff] }
 0x3b1   :  { %644 = vmatpush1.msra.mxu0 %v601_v55  ;;  %v722_v55 = vld [vmem:[#allocation4 + $0xb0] sm:$0xff] }
 0x3b2   :  { %645 = vmatprep.subr.mxu0 %v600_v57  ;;  %v721_v57 = vld [vmem:[#allocation4 + $0xa8] sm:$0xff] }
 0x3b3   :  { %646 = vmatpush1.msra.mxu0 %v599_v58  ;;  %v720_v58 = vld [vmem:[#allocation4 + $0xa0] sm:$0xff] }
 0x3b4   :  { %647 = vmatprep.subr.mxu0 %v598_v59  ;;  %v719_v59 = vld [vmem:[#allocation4 + $0x98] sm:$0xff] }
 0x3b5   :  { %648 = vmatpush1.msra.mxu0 %v597_v60  ;;  %v718_v60 = vld [vmem:[#allocation4 + $0x90] sm:$0xff] }
 0x3b6   :  { %649 = vmatprep.subr.mxu0 %v596_v62  ;;  %v717_v62 = vld [vmem:[#allocation4 + $0x88] sm:$0xff] }
 0x3b7   :  { %650 = vmatpush1.msra.mxu0 %v595_v63  ;;  %v716_v63 = vld [vmem:[#allocation4 + $0x80] sm:$0xff] }
 0x3b8   :  { %651 = vmatprep.subr.mxu0 %v594_v1  ;;  %v715_v1 = vld [vmem:[#allocation4 + $0x78] sm:$0xff] }
 0x3b9   :  { %652 = vmatpush1.msra.mxu0 %v593_v17  ;;  %v703_v17 = vld [vmem:[#allocation4 + $0x18] sm:$0xff] }
 0x3ba   :  { %653 = vmatprep.subr.mxu0 %v592_v18  ;;  %v702_v18 = vld [vmem:[#allocation4 + $0x10] sm:$0xff] }
 0x3bb   :  { %654 = vmatpush1.msra.mxu0 %v591_v19  ;;  %v701_v19 = vld [vmem:[#allocation4 + $0x8] sm:$0xff] }
 0x3bc   :  { %655 = vmatprep.subr.mxu0 %v590_v20  ;;  %v700_v20 = vld [vmem:[#allocation4] sm:$0xff] }
 0x3bd   :  { %656 = vmatpush1.msra.mxu0 %v589_v22  ;;  %v746_v22 = vld [vmem:[#allocation4 + $0x170] sm:$0xff] }
 0x3be   :  { %657 = vmatprep.subr.mxu0 %v588_v23  ;;  %v745_v23 = vld [vmem:[#allocation4 + $0x168] sm:$0xff] }
 0x3bf   :  { %658 = vmatpush1.msra.mxu0 %v587_v24  ;;  %v744_v24 = vld [vmem:[#allocation4 + $0x160] sm:$0xff] }
 0x3ea   :  { %v532_v35 = vpop.permute.xlu0 %531  ;;  %v542_v36 = vpop.permute.xlu1 %541 }
 0x3eb   :  { %v534_v37 = vmul.f32 %v532_v35, %v1654_v56  ;;  %v544_v43 = vmul.f32 %v542_v36, %v1654_v56 }
 0x3ed   :  { %536 = vrot.lane.b32.xlu1 %v534_v37, %s1452_s26 }
 0x3ef   :  { %v552_v44 = vpop.permute.xlu1 %551  ;;  %v568_v48 = vpop.permute.xlu0 %567 }
 0x3f0   :  { %v554_v49 = vmul.f32 %v552_v44, %v1654_v56  ;;  %v570_v54 = vmul.f32 %v568_v48, %v1659_v61  ;;  %v730_v44 = vld [vmem:[#allocation4 + $0xf0] sm:$0xff]  ;;  %v728_v48 = vld [vmem:[#allocation4 + $0xe0] sm:$0xff] }
 0x3f1   :  { %546 = vrot.lane.b32.xlu1 %v544_v43, %s1453_s4  ;;  %v731_v43 = vld [vmem:[#allocation4 + $0xf8] sm:$0xff] }
 0x3f2   :  { %556 = vrot.lane.b32.xlu0 %v554_v49, %s1454_s9  ;;  %763 = vmatprep.subr.mxu0 %v731_v43  ;;  %v727_v49 = vld [vmem:[#allocation4 + $0xd8] sm:$0xff] }
 0x3f3   :  { %v469_v8 = vpop.permute.xlu0 %468 }
 0x3f4   :  { %v459_v2 = vpop.permute.xlu1 %458 }
 0x3f5   :  { %572 = vrot.lane.b32.xlu1 %v570_v54, %s1452_s26  ;;  %v461_v5 = vmul.f32 %v459_v2, %v1654_v56  ;;  %v723_v54 = vld [vmem:[#allocation4 + $0xb8] sm:$0xff]  ;;  %v714_v2 = vld [vmem:[#allocation4 + $0x70] sm:$0xff] }
 0x3f7   :  { %v471_v9 = vadd.f32 %v469_v8, %v461_v5  ;;  %v712_v5 = vld [vmem:[#allocation4 + $0x60] sm:$0xff]  ;;  %v710_v8 = vld [vmem:[#allocation4 + $0x50] sm:$0xff] }
 0x3f9   :  { %v474_v3 = vpop.permute.xlu1 %473 }
 0x3fa   :  { %v476_v7 = vmul.f32 %v474_v3, %v1659_v61  ;;  %v713_v3 = vld [vmem:[#allocation4 + $0x68] sm:$0xff] }
 0x3fc   :  { %v477_v10 = vadd.f32 %v476_v7, %v471_v9  ;;  %v711_v7 = vld [vmem:[#allocation4 + $0x58] sm:$0xff]  ;;  %v709_v9 = vld [vmem:[#allocation4 + $0x48] sm:$0xff] }
 0x3fd   :  { %v485_v11 = vpop.permute.xlu1 %484 }
 0x3fe   :  { %v487_v12 = vadd.f32 %v485_v11, %v477_v10  ;;  %v708_v10 = vld [vmem:[#allocation4 + $0x40] sm:$0xff]  ;;  %v707_v11 = vld [vmem:[#allocation4 + $0x38] sm:$0xff] }
 0x401   :  { %v527_v21 = vpop.permute.xlu1 %526 }
 0x402   :  { %v529_v26 = vmul.f32 %v527_v21, %v1654_v56  ;;  %v747_v21 = vld [vmem:[#allocation4 + $0x178] sm:$0xff] }
 0x416   :  { %v578_v14 = vpop.permute.xlu0 %577 }
 0x417   :  { %v581_v15 = vsel %vm580_vm8, %v487_v12, %v578_v14  ;;  %v706_v12 = vld [vmem:[#allocation4 + $0x30] sm:$0xff]  ;;  %v705_v14 = vld [vmem:[#allocation4 + $0x28] sm:$0xff] }
 0x418   :  { %1284 = vmatmul.mubr.msk.f32.vlgmr.msra.gmra.mxu1 %vm251_vm3, %v581_v15 }
 0x419   :  { %1302 = vmatprep.mubr.msk.f32.mxu1 %vm1441_vm2, %v1440_v0 }
 0x423   :  { %v562_v27 = vpop.permute.xlu0 %561 }
 0x424   :  { %v564_v33 = vmul.f32 %v562_v27, %v1659_v61  ;;  %v741_v27 = vld [vmem:[#allocation4 + $0x148] sm:$0xff] }
 0x45f   :  { %v537_v25 = vpop.permute.xlu1 %536 }
 0x460   :  { %v539_v28 = vadd.f32 %v537_v25, %v529_v26  ;;  %v743_v25 = vld [vmem:[#allocation4 + $0x158] sm:$0xff]  ;;  %v742_v26 = vld [vmem:[#allocation4 + $0x150] sm:$0xff] }
 0x463   :  { %v547_v29 = vpop.permute.xlu1 %546 }
 0x464   :  { %v549_v30 = vadd.f32 %v547_v29, %v539_v28  ;;  %v557_v31 = vpop.permute.xlu0 %556  ;;  %v740_v28 = vld [vmem:[#allocation4 + $0x140] sm:$0xff]  ;;  %v739_v29 = vld [vmem:[#allocation4 + $0x138] sm:$0xff] }
 0x466   :  { %v559_v34 = vadd.f32 %v557_v31, %v549_v30  ;;  %v738_v30 = vld [vmem:[#allocation4 + $0x130] sm:$0xff]  ;;  %v737_v31 = vld [vmem:[#allocation4 + $0x128] sm:$0xff] }
 0x467   :  { %v573_v36 = vpop.permute.xlu1 %572 }
 0x468   :  { %v565_v35 = vadd.f32 %v564_v33, %v559_v34  ;;  %v736_v33 = vld [vmem:[#allocation4 + $0x120] sm:$0xff]  ;;  %v735_v34 = vld [vmem:[#allocation4 + $0x118] sm:$0xff] }
 0x46a   :  { %v575_v37 = vadd.f32 %v573_v36, %v565_v35  ;;  %v734_v35 = vld [vmem:[#allocation4 + $0x110] sm:$0xff]  ;;  %v733_v36 = vld [vmem:[#allocation4 + $0x108] sm:$0xff] }
 0x46c   :  { %583 = vrot.lane.b32.xlu0 %v575_v37, %s1453_s4  ;;  %v732_v37 = vld [vmem:[#allocation4 + $0x100] sm:$0xff] }
 0x4d8   :  { %v918_v39 = vpop.f32.mrf.mxu1 }
 0x4d9   :  { %v1801_v40 = vadd.f32 %v1215_v38, %v918_v39 }
 0x4da   :  { %v1285_v56 = vpop.f32.mrf.mxu1 }
 0x4db   :  { %v933_v41 = vsel %vm423_vm5, %v1801_v40, -inf }
 0x4dc   :  { %934 = vmax.xlane.f32.xlu1 %v933_v41 }
 0x4de   :  { %v584_v61 = vpop.permute.xlu0 %583 }
 0x4df   :  { %v586_v42 = vsel %vm251_vm3, %v581_v15, %v584_v61  ;;  %v704_v15 = vld [vmem:[#allocation4 + $0x20] sm:$0xff]  ;;  %v922_v61 = vsel %vm411_vm6, %v1801_v40, -inf }
 0x4e0   :  { %1213 = vmatmul.mubr.msk.f32.vlgmr.msra.gmra.mxu0 %vm623_vm9, %v586_v42  ;;  %v611_v42 = vld [vmem:[%s1922_s8] sm:$0x3] }
 0x4e1   :  { %764 = vmatpush1.msra.mxu0 %v730_v44  ;;  %v616_v43 = vrot.slane %v611_v42, %v1620_v4  ;;  %v620_v44 = vrot.slane %v611_v42, %v1625_v6 }
 0x4e2   :  { %765 = vmatprep.subr.mxu0 %v729_v45 }
 0x4e3   :  { %766 = vmatpush1.msra.mxu0 %v728_v48 }
 0x4e4   :  { %767 = vmatprep.subr.mxu0 %v727_v49 }
 0x4e5   :  { %768 = vmatpush1.msra.mxu0 %v726_v51 }
 0x4e6   :  { %769 = vmatprep.subr.mxu0 %v725_v52 }
 0x4e7   :  { %770 = vmatpush1.msra.mxu0 %v724_v53 }
 0x4e8   :  { %771 = vmatprep.subr.mxu0 %v723_v54 }
 0x4e9   :  { %772 = vmatpush1.msra.mxu0 %v722_v55 }
 0x4ea   :  { %773 = vmatprep.subr.mxu0 %v721_v57 }
 0x4eb   :  { %774 = vmatpush1.msra.mxu0 %v720_v58 }
 0x4ec   :  { %775 = vmatprep.subr.mxu0 %v719_v59 }
 0x4ed   :  { %776 = vmatpush1.msra.mxu0 %v718_v60 }
 0x4ee   :  { %777 = vmatprep.subr.mxu0 %v717_v62 }
 0x4ef   :  { %778 = vmatpush1.msra.mxu0 %v716_v63 }
 0x4f0   :  { %779 = vmatprep.subr.mxu0 %v715_v1 }
 0x4f1   :  { %780 = vmatpush1.msra.mxu0 %v714_v2 }
 0x4f2   :  { %781 = vmatprep.subr.mxu0 %v713_v3 }
 0x4f3   :  { %782 = vmatpush1.msra.mxu0 %v712_v5 }
 0x4f4   :  { %783 = vmatprep.subr.mxu0 %v711_v7 }
 0x4f5   :  { %784 = vmatpush1.msra.mxu0 %v710_v8 }
 0x4f6   :  { %785 = vmatprep.subr.mxu0 %v709_v9 }
 0x4f7   :  { %786 = vmatpush1.msra.mxu0 %v708_v10 }
 0x4f8   :  { %787 = vmatprep.subr.mxu0 %v707_v11 }
 0x4f9   :  { %788 = vmatpush1.msra.mxu0 %v706_v12 }
 0x4fa   :  { %789 = vmatprep.subr.mxu0 %v705_v14 }
 0x4fb   :  { %790 = vmatpush1.msra.mxu0 %v704_v15  ;;  %v1026_v15 = vld [vmem:[%s1927_s13 + $0x28] sm:$0xff] }
 0x4fc   :  { %791 = vmatprep.subr.mxu0 %v703_v17  ;;  %v1025_v17 = vld [vmem:[%s1927_s13 + $0x20] sm:$0xff] }
 0x4fd   :  { %792 = vmatpush1.msra.mxu0 %v702_v18 }
 0x4fe   :  { %793 = vmatprep.subr.mxu0 %v701_v19 }
 0x4ff   :  { %794 = vmatpush1.msra.mxu0 %v700_v20  ;;  %v1024_v20 = vld [vmem:[%s1927_s13 + $0x18] sm:$0xff] }
 0x500   :  { %811 = vmatprep.subr.mxu0 %v747_v21  ;;  %v1023_v21 = vld [vmem:[%s1927_s13 + $0x10] sm:$0xff] }
 0x501   :  { %812 = vmatpush2.msra.mxu0 %v746_v22 }
 0x502   :  { %813 = vmatprep.subr.mxu0 %v745_v23  ;;  %v1022_v23 = vld [vmem:[%s1927_s13 + $0x8] sm:$0xff] }
 0x503   :  { %814 = vmatpush2.msra.mxu0 %v744_v24 }
 0x504   :  { %815 = vmatprep.subr.mxu0 %v743_v25 }
 0x505   :  { %816 = vmatpush2.msra.mxu0 %v742_v26  ;;  %v1021_v26 = vld [vmem:[%s1927_s13] sm:$0xff] }
 0x506   :  { %817 = vmatprep.subr.mxu0 %v741_v27 }
 0x507   :  { %818 = vmatpush2.msra.mxu0 %v740_v28 }
 0x508   :  { %819 = vmatprep.subr.mxu0 %v739_v29 }
 0x509   :  { %820 = vmatpush2.msra.mxu0 %v738_v30 }
 0x50a   :  { %821 = vmatprep.subr.mxu0 %v737_v31 }
 0x50b   :  { %822 = vmatpush2.msra.mxu0 %v736_v33 }
 0x50c   :  { %823 = vmatprep.subr.mxu0 %v735_v34 }
 0x50d   :  { %824 = vmatpush2.msra.mxu0 %v734_v35 }
 0x50e   :  { %825 = vmatprep.subr.mxu0 %v733_v36 }
 0x50f   :  { %826 = vmatpush2.msra.mxu0 %v732_v37 }
 0x565   :  { %v935_v38 = vpop.xlane.xlu1 %934 }
 0x566   :  { %v936_v39 = vsub.f32 %v1801_v40, %v935_v38 }
 0x568   :  { %v937_v56 = vmul.f32 1.442695, %v936_v39 }
 0x56a   :  { %1384 = vpow2.f32 %v937_v56 }
 0x577   :  { %v1385_v41 = vpop.eup %1384 }
 0x578   :  { %940 = vrot.lane.b32.xlu0 %v1385_v41, %s1442_s2 }
 0x597   :  { %923 = vmax.xlane.f32.xlu0 %v922_v61 }
 0x5a0   :  { %v693_v45 = vpop.f32.mrf.mxu0 }
 0x5a1   :  { %v694_v48 = vadd.f32 %v693_v45, %v616_v43 }
 0x5a2   :  { %v695_v49 = vpop.f32.mrf.mxu0 }
 0x5a3   :  { %v696_v51 = vadd.f32 %v695_v49, %v620_v44  ;;  %v698_v53 = vmax.f32 %v694_v48, 0.0  ;;  %v1117_v44 = vld [vmem:[%s1929_s15 + $0x38] sm:$0xff]  ;;  %v1116_v48 = vld [vmem:[%s1929_s15 + $0x30] sm:$0xff]  ;;  %v1115_v49 = vld [vmem:[%s1929_s15 + $0x28] sm:$0xff] }
 0x5a5   :  { %v699_v52 = vmax.f32 %v696_v51, 0.0  ;;  %v1114_v51 = vld [vmem:[%s1929_s15 + $0x20] sm:$0xff] }
 0x5a7   :  { %1214 = vmatprep.mubr.msk.f32.mxu0 %vm251_vm3, %v699_v52  ;;  %v1113_v52 = vld [vmem:[%s1929_s15 + $0x18] sm:$0xff] }
 0x5a8   :  { %828 = vmatmul.mubr.f32.vlgmr.msra.gmra.mxu0 %v698_v53  ;;  %v1112_v53 = vld [vmem:[%s1929_s15 + $0x10] sm:$0xff] }
 0x5ea   :  { %v941_v54 = vpop.permute.xlu0 %940 }
 0x5eb   :  { %v943_v55 = vsel %vm411_vm6, %v941_v54, 0.0  ;;  %v1111_v54 = vld [vmem:[%s1929_s15 + $0x8] sm:$0xff] }
 0x5ec   :  { %944 = vadd.xlane.f32.xlu1 %v943_v55  ;;  %v1110_v55 = vld [vmem:[%s1929_s15] sm:$0xff] }
 0x620   :  { %v924_v57 = vpop.xlane.xlu0 %923 }
 0x621   :  { %v925_v58 = vsub.f32 %v1801_v40, %v924_v57  ;;  %v1217_v57 = vld [vmem:[%s1928_s14] ss:$0 sm:$0xff] }
 0x623   :  { %v926_v59 = vmul.f32 1.442695, %v925_v58 }
 0x625   :  { %1386 = vpow2.f32 %v926_v59 }
 0x632   :  { %v1387_v60 = vpop.eup %1386 }
 0x633   :  { %v928_v62 = vsel %vm411_vm6, %v1387_v60, 0.0 }
 0x634   :  { %929 = vadd.xlane.f32.xlu0 %v928_v62 }
 0x668   :  { %v829_v7 = vpop.f32.mrf.mxu0 }
 0x66a   :  { %v831_v10 = vpop.f32.mrf.mxu0 }
 0x675   :  { %v945_v63 = vpop.xlane.xlu1 %944 }
 0x676   :  { %1388 = vrcp.f32 %v945_v63  ;;  %v1219_v63 = vld [vmem:[%s1930_s16] ss:$0 sm:$0xff] }
 0x683   :  { %v1389_v1 = vpop.eup %1388 }
 0x684   :  { %v947_v2 = vmul.f32 %v1389_v1, %v1385_v41 }
 0x686   :  { %987 = vperm.xlu1 %1363, %v947_v2   ;;  %997 = vperm.xlu0 %1364, %v947_v2  }
 0x68a   :  { %1365 = vset.pattern.permute.xlu1 %v1447_v46  ;;  %1370 = vset.pattern.permute.xlu0 %v1459_v16 }
 0x68b   :  { %1007 = vperm.xlu1 %1365, %v947_v2  }
 0x68f   :  { %1366 = vset.pattern.permute.xlu1 %v1443_v32  ;;  %v748_v32 = vld [vmem:[%s1924_s10] sm:$0x3] }
 0x690   :  { %v753_v16 = vrot.slane %v748_v32, %v1620_v4  ;;  %v757_v9 = vrot.slane %v748_v32, %v1625_v6  ;;  %v1028_v4 = vld [vmem:[%s1927_s13 + $0x38] sm:$0xff]  ;;  %v1027_v6 = vld [vmem:[%s1927_s13 + $0x30] sm:$0xff] }
 0x691   :  { %1287 = vmatpush3.msra.mxu1 %v1028_v4 }
 0x692   :  { %v830_v8 = vadd.f32 %v829_v7, %v753_v16  ;;  %v832_v12 = vadd.f32 %v831_v10, %v757_v9  ;;  %1288 = vmatprep.subr.mxu1 %v1440_v0 }
 0x693   :  { %1289 = vmatpush3.msra.mxu1 %v1027_v6 }
 0x694   :  { %1290 = vmatprep.subr.mxu1 %v1440_v0 }
 0x695   :  { %1291 = vmatpush3.msra.mxu1 %v1026_v15 }
 0x696   :  { %1292 = vmatprep.subr.mxu1 %v1440_v0 }
 0x697   :  { %1293 = vmatpush3.msra.mxu1 %v1025_v17 }
 0x698   :  { %1294 = vmatprep.subr.mxu1 %v1440_v0 }
 0x699   :  { %1295 = vmatpush3.msra.mxu1 %v1024_v20 }
 0x69a   :  { %1296 = vmatprep.subr.mxu1 %v1440_v0 }
 0x69b   :  { %1297 = vmatpush3.msra.mxu1 %v1023_v21 }
 0x69c   :  { %1298 = vmatprep.subr.mxu1 %v1440_v0 }
 0x69d   :  { %1299 = vmatpush3.msra.mxu1 %v1022_v23 }
 0x69e   :  { %1300 = vmatprep.subr.mxu1 %v1440_v0 }
 0x69f   :  { %1301 = vmatpush3.msra.mxu1 %v1021_v26 }
 0x6a0   :  { %1305 = vmatprep.subr.mxu1 %v1440_v0 }
 0x6bd   :  { %v930_v40 = vpop.xlane.xlu0 %929 }
 0x6be   :  { %1390 = vrcp.f32 %v930_v40 }
 0x6cb   :  { %v1391_v3 = vpop.eup %1390 }
 0x6cc   :  { %v932_v5 = vmul.f32 %v1391_v3, %v1387_v60 }
 0x6ce   :  { %965 = vperm.xlu0 %1370, %v932_v5   ;;  %955 = vperm.xlu1 %1366, %v932_v5  }
 0x6d2   :  { %1367 = vset.pattern.permute.xlu1 %v1449_v50  ;;  %1371 = vset.pattern.permute.xlu0 %v1447_v46 }
 0x6d3   :  { %971 = vperm.xlu1 %1367, %v932_v5  }
 0x6d7   :  { %1368 = vset.pattern.permute.xlu1 %v1448_v47 }
 0x6d8   :  { %982 = vperm.xlu1 %1368, %v947_v2  }
 0x6dc   :  { %1369 = vset.pattern.permute.xlu1 %v1457_v13 }
 0x701   :  { %v988_v50 = vpop.permute.xlu1 %987  ;;  %v998_v46 = vpop.permute.xlu0 %997 }
 0x702   :  { %v990_v11 = vmul.f32 %v988_v50, %v830_v8  ;;  %v1000_v47 = vmul.f32 %v998_v46, %v832_v12 }
 0x704   :  { %992 = vrot.lane.b32.xlu1 %v990_v11, %s1452_s26 }
 0x706   :  { %v1008_v14 = vpop.permute.xlu1 %1007 }
 0x707   :  { %v1010_v13 = vmul.f32 %v1008_v14, %v832_v12 }
 0x708   :  { %1002 = vrot.lane.b32.xlu1 %v1000_v47, %s1453_s4 }
 0x70c   :  { %1012 = vrot.lane.b32.xlu1 %v1010_v13, %s1454_s9 }
 0x710   :  { %950 = vperm.xlu1 %1369, %v932_v5  }
 0x749   :  { %v956_v18 = vpop.permute.xlu1 %955  ;;  %v966_v38 = vpop.permute.xlu0 %965 }
 0x74a   :  { %v958_v19 = vmul.f32 %v956_v18, %v830_v8  ;;  %v968_v56 = vmul.f32 %v966_v38, %v832_v12 }
 0x74c   :  { %960 = vrot.lane.b32.xlu1 %v958_v19, %s1452_s26 }
 0x74e   :  { %v972_v22 = vpop.permute.xlu1 %971 }
 0x74f   :  { %v974_v24 = vmul.f32 %v972_v22, %v832_v12 }
 0x751   :  { %976 = vrot.lane.b32.xlu1 %v974_v24, %s1452_s26 }
 0x753   :  { %v983_v25 = vpop.permute.xlu1 %982 }
 0x754   :  { %v985_v28 = vmul.f32 %v983_v25, %v830_v8 }
 0x776   :  { %v993_v27 = vpop.permute.xlu1 %992 }
 0x777   :  { %v995_v30 = vadd.f32 %v993_v27, %v985_v28 }
 0x77a   :  { %v1003_v29 = vpop.permute.xlu1 %1002 }
 0x77b   :  { %v1005_v31 = vadd.f32 %v1003_v29, %v995_v30 }
 0x77e   :  { %v1013_v33 = vpop.permute.xlu1 %1012 }
 0x77f   :  { %v1015_v34 = vadd.f32 %v1013_v33, %v1005_v31 }
 0x781   :  { %1017 = vrot.lane.b32.xlu0 %v1015_v34, %s1452_s26 }
 0x78b   :  { %v951_v35 = vpop.permute.xlu1 %950 }
 0x78c   :  { %v953_v37 = vmul.f32 %v951_v35, %v830_v8 }
 0x7be   :  { %v961_v36 = vpop.permute.xlu1 %960 }
 0x7bf   :  { %v963_v39 = vadd.f32 %v961_v36, %v953_v37 }
 0x7c1   :  { %v969_v41 = vadd.f32 %v968_v56, %v963_v39 }
 0x7c3   :  { %v977_v61 = vpop.permute.xlu1 %976 }
 0x7c4   :  { %v979_v42 = vadd.f32 %v977_v61, %v969_v41 }
 0x7f3   :  { %v1018_v43 = vpop.permute.xlu0 %1017 }
 0x7f4   :  { %v1020_v45 = vsel %vm580_vm8, %v979_v42, %v1018_v43 }
 0x7f5   :  { %1303 = vmatmul.mubr.msk.f32.vlgmr.msra.gmra.mxu1 %vm251_vm3, %v1020_v45 }
 0x7f6   :  { %1306 = vmatpush3.msra.mxu1 %v1117_v44  ;;  %1321 = vmatprep.mubr.msk.f32.mxu1 %vm1441_vm2, %v1440_v0 }
 0x7f7   :  { %1307 = vmatprep.subr.mxu1 %v1440_v0 }
 0x7f8   :  { %1308 = vmatpush3.msra.mxu1 %v1116_v48 }
 0x7f9   :  { %1309 = vmatprep.subr.mxu1 %v1440_v0 }
 0x7fa   :  { %1310 = vmatpush3.msra.mxu1 %v1115_v49 }
 0x7fb   :  { %1311 = vmatprep.subr.mxu1 %v1440_v0 }
 0x7fc   :  { %1312 = vmatpush3.msra.mxu1 %v1114_v51 }
 0x7fd   :  { %1313 = vmatprep.subr.mxu1 %v1440_v0 }
 0x7fe   :  { %1314 = vmatpush3.msra.mxu1 %v1113_v52 }
 0x7ff   :  { %1315 = vmatprep.subr.mxu1 %v1440_v0 }
 0x800   :  { %1316 = vmatpush3.msra.mxu1 %v1112_v53 }
 0x801   :  { %1317 = vmatprep.subr.mxu1 %v1440_v0 }
 0x802   :  { %1318 = vmatpush3.msra.mxu1 %v1111_v54 }
 0x803   :  { %1319 = vmatprep.subr.mxu1 %v1440_v0 }
 0x804   :  { %1320 = vmatpush3.msra.mxu1 %v1110_v55 }
 0x8b5   :  { %v1105_v58 = vpop.f32.mrf.mxu1 }
 0x8b6   :  { %v1106_v59 = vadd.f32 %v1217_v57, %v1105_v58 }
 0x8b7   :  { %v1304_v60 = vpop.f32.mrf.mxu1 }
 0x8b8   :  { %v1109_v62 = vmax.f32 %v1106_v59, 0.0 }
 0x8ba   :  { %1322 = vmatmul.mubr.msk.f32.vlgmr.msra.gmra.mxu1 %vm251_vm3, %v1109_v62 }
 0x97a   :  { %v1194_v0 = vpop.f32.mrf.mxu1 }
 0x97b   :  { %v1195_v1 = vadd.f32 %v1219_v63, %v1194_v0 }
 0x97c   :  { %v1323_v2 = vpop.f32.mrf.mxu1 }
 0x97d   :  { %1199 = vst.msk [vmem:[%s1931_s17] sm:$0xff] %vm1198_vm10, %v1195_v1 }
 0x97e   :  { %1204 = vsyncpa [#allocation3], 1 }
 0x97f   :  { %1205 = vsyncpa [#allocation5], 1 }

</bundles_post_ra>
